<compile_context>
chip_gen: v7x
topology: tpu7x:2x2x1
jax: 0.10.0
libtpu: 0.0.40
codegen_flags: <defaults>
</compile_context>

<pallas_src>
import jax
import jax.numpy as jnp
from jax.experimental import pallas as pl
from jax.experimental.pallas import tpu as pltpu

# ----------------------------- model sizes ---------------------------------
IN_DIM = 48        # observation size fed to memory_a.rnn
HIDDEN = 32        # LSTM hidden_size
NUM_LAYERS = 2     # LSTM num_layers
ACTOR_H1 = 64      # actor MLP hidden sizes
ACTOR_H2 = 64
NUM_ACTIONS = 12

LANES = 128
GATES = 4 * HIDDEN
assert GATES == LANES, "slab layout assumes 4 * hidden_size == 128 lanes"

# ---------------- packed bf16 weight-slab row layout (matmul weights) -------
R_WIH0 = 0                          # (IN_DIM, 4H)
R_WHH0 = R_WIH0 + IN_DIM            # (H, 4H)          = 48
R_WIH1 = R_WHH0 + HIDDEN            # (H, 4H)          = 80
R_WHH1 = R_WIH1 + HIDDEN            # (H, 4H)          = 112
R_WA0 = R_WHH1 + HIDDEN             # (H, 128)         = 144  (64 cols used)
R_WA1 = R_WA0 + HIDDEN              # (64, 128)        = 176  (64 cols used)
R_WA2 = R_WA1 + ACTOR_H1            # (64, 128)        = 240  (12 cols used)
SLAB_ROWS = ((R_WA2 + ACTOR_H2 + 15) // 16) * 16       # 304, bf16 sublane-aligned

# ---------------- f32 bias slab rows ----------------------------------------
B_L0, B_L1, B_A0, B_A1, B_A2 = 0, 1, 2, 3, 4
BIAS_ROWS = 8                       # sublane-aligned


def pack_params(params):
    """Pack matmul weights into one bf16 (SLAB_ROWS, 128) slab + f32 bias slab."""
    wih0, wih1, whh, b, wa0, ba0, wa1, ba1, wa2, ba2 = params

    def lane_pad(m):
        return jnp.pad(m, ((0, 0), (0, LANES - m.shape[1])))

    w = jnp.zeros((SLAB_ROWS, LANES), jnp.float32)
    w = w.at[R_WIH0:R_WIH0 + IN_DIM].set(wih0)
    w = w.at[R_WHH0:R_WHH0 + HIDDEN].set(whh[0])
    w = w.at[R_WIH1:R_WIH1 + HIDDEN].set(wih1)
    w = w.at[R_WHH1:R_WHH1 + HIDDEN].set(whh[1])
    w = w.at[R_WA0:R_WA0 + HIDDEN].set(lane_pad(wa0))
    w = w.at[R_WA1:R_WA1 + ACTOR_H1].set(lane_pad(wa1))
    w = w.at[R_WA2:R_WA2 + ACTOR_H2].set(lane_pad(wa2))
    w_slab = w.astype(jnp.bfloat16)

    bias = jnp.zeros((BIAS_ROWS, LANES), jnp.float32)
    bias = bias.at[B_L0].set(b[0])
    bias = bias.at[B_L1].set(b[1])
    bias = bias.at[B_A0].set(lane_pad(ba0)[0])
    bias = bias.at[B_A1].set(lane_pad(ba1)[0])
    bias = bias.at[B_A2].set(lane_pad(ba2)[0])
    return w_slab, bias


# ------------------------------ kernel body ---------------------------------
def _elu(x):
    # ELU(alpha=1); exp-1 form kept for guaranteed Mosaic lowering (bf16 weight
    # quantization dominates the error budget anyway).
    return jnp.where(x > 0.0, x, jnp.exp(jnp.minimum(x, 0.0)) - 1.0)


def _gates_to_state(gates, c_prev):
    """PyTorch gate order [i, f, g, o]; gates: (B, 4H) f32, c_prev: (B, H) f32."""
    sg = jax.nn.sigmoid(gates)          # one EUP sweep over the full gate vreg row
    tg = jnp.tanh(gates)                # one EUP sweep
    i = sg[:, 0 * HIDDEN:1 * HIDDEN]
    f = sg[:, 1 * HIDDEN:2 * HIDDEN]
    g = tg[:, 2 * HIDDEN:3 * HIDDEN]
    o = sg[:, 3 * HIDDEN:4 * HIDDEN]
    c_new = f * c_prev + i * g
    h_new = o * jnp.tanh(c_new)
    return h_new, c_new


def policy_lstm_kernel(x_ref, state_in_ref, w_ref, b_ref,
                       act_ref, state_out_ref, st_ref):
    t = pl.program_id(0)

    # Load initial recurrent state into the VMEM carry scratch on the first step.
    @pl.when(t == 0)
    def _init():
        st_ref[...] = state_in_ref[...]

    x = x_ref[0]                        # (B, IN_DIM) f32
    h0 = st_ref[0]                      # (B, H) f32   carry rows: [h0, h1, c0, c1]
    h1 = st_ref[1]
    c0 = st_ref[2]
    c1 = st_ref[3]

    def dot_w(a, row0, nrows):
        # bf16 x bf16 MXU issue, f32 accumulation.
        return jnp.dot(a.astype(jnp.bfloat16), w_ref[row0:row0 + nrows, :],
                       preferred_element_type=jnp.float32)

    # ---- stacked LSTM, one timestep ----
    g0 = dot_w(x, R_WIH0, IN_DIM) + dot_w(h0, R_WHH0, HIDDEN) + b_ref[B_L0:B_L0 + 1, :]
    h0n, c0n = _gates_to_state(g0, c0)

    g1 = dot_w(h0n, R_WIH1, HIDDEN) + dot_w(h1, R_WHH1, HIDDEN) + b_ref[B_L1:B_L1 + 1, :]
    h1n, c1n = _gates_to_state(g1, c1)

    # ---- actor MLP on top-layer h; lane-padded to 128, pad lanes stay exactly 0 ----
    a = _elu(dot_w(h1n, R_WA0, HIDDEN) + b_ref[B_A0:B_A0 + 1, :])
    a = _elu(dot_w(a[:, :ACTOR_H1], R_WA1, ACTOR_H1) + b_ref[B_A1:B_A1 + 1, :])
    act = dot_w(a[:, :ACTOR_H2], R_WA2, ACTOR_H2) + b_ref[B_A2:B_A2 + 1, :]

    act_ref[0] = act                    # lane-dense (B, 128) store; sliced in wrapper

    # update carry (read everything above before writing)
    st_ref[0] = h0n
    st_ref[1] = h1n
    st_ref[2] = c0n
    st_ref[3] = c1n

    # write the recurrent state back to HBM only on the final step
    @pl.when(t == pl.num_programs(0) - 1)
    def _flush():
        state_out_ref[...] = st_ref[...]


@jax.jit
def policy_lstm_rollout(x, state, w_slab, b_slab):
    """x: (T, B, IN_DIM); state: (2*NUM_LAYERS, B, HIDDEN) = [h0,h1,c0,c1]."""
    T, B, _ = x.shape
    act_pad, new_state = pl.pallas_call(
        policy_lstm_kernel,
        grid=(T,),
        in_specs=[
            pl.BlockSpec((1, B, IN_DIM), lambda t: (t, 0, 0)),             # x_t stream
            pl.BlockSpec((2 * NUM_LAYERS, B, HIDDEN), lambda t: (0, 0, 0)),  # state (read @ t=0)
            pl.BlockSpec((SLAB_ROWS, LANES), lambda t: (0, 0)),            # weights: DMA'd once
            pl.BlockSpec((BIAS_ROWS, LANES), lambda t: (0, 0)),            # biases: DMA'd once
        ],
        out_specs=(
            pl.BlockSpec((1, B, LANES), lambda t: (t, 0, 0)),              # act_t stream
            pl.BlockSpec((2 * NUM_LAYERS, B, HIDDEN), lambda t: (0, 0, 0)),  # final state
        ),
        out_shape=(
            jax.ShapeDtypeStruct((T, B, LANES), jnp.float32),
            jax.ShapeDtypeStruct((2 * NUM_LAYERS, B, HIDDEN), jnp.float32),
        ),
        scratch_shapes=[pltpu.VMEM((2 * NUM_LAYERS, B, HIDDEN), jnp.float32)],
        input_output_aliases={1: 1},    # recurrent-state buffer updated in place
        compiler_params=pltpu.CompilerParams(
            dimension_semantics=("arbitrary",)),  # serial recurrence over time
    )(x, state, w_slab, b_slab)
    return act_pad[:, :, :NUM_ACTIONS], new_state


# ------------------------- pure-JAX reference -------------------------------
def reference_rollout(x, h, c, params, quantize):
    """f32 reference; with quantize=True mirrors the kernel's bf16 operand casts."""
    wih0, wih1, whh, b, wa0, ba0, wa1, ba1, wa2, ba2 = params
    q = (lambda m: m.astype(jnp.bfloat16).astype(jnp.float32)) if quantize else (lambda m: m)
    wih0, wih1 = q(wih0), q(wih1)
    whh0, whh1 = q(whh[0]), q(whh[1])
    wa0, wa1, wa2 = q(wa0), q(wa1), q(wa2)         # biases stay f32 (as in the kernel)

    def cell(x_, h_, c_, w_ih, w_hh, b_):
        g = q(x_) @ w_ih + q(h_) @ w_hh + b_
        i = jax.nn.sigmoid(g[:, 0 * HIDDEN:1 * HIDDEN])
        f = jax.nn.sigmoid(g[:, 1 * HIDDEN:2 * HIDDEN])
        gg = jnp.tanh(g[:, 2 * HIDDEN:3 * HIDDEN])
        o = jax.nn.sigmoid(g[:, 3 * HIDDEN:4 * HIDDEN])
        cn = f * c_ + i * gg
        hn = o * jnp.tanh(cn)
        return hn, cn

    h0, h1, c0, c1 = h[0], h[1], c[0], c[1]
    acts = []
    for t in range(x.shape[0]):
        h0, c0 = cell(x[t], h0, c0, wih0, whh0, b[0:1])
        h1, c1 = cell(h0, h1, c1, wih1, whh1, b[1:2])
        a = jax.nn.elu(q(h1) @ wa0 + ba0)
        a = jax.nn.elu(q(a) @ wa1 + ba1)
        acts.append(q(a) @ wa2 + ba2)
    return jnp.stack(acts, 0), jnp.stack([h0, h1], 0), jnp.stack([c0, c1], 0)


if __name__ == "__main__":
    key = jax.random.PRNGKey(0)
    ks = jax.random.split(key, 12)
    T, B = 8, 64     # rollout length, env batch (multiple of 8 sublanes)

    # deterministic synthetic parameters (LSTM weights pre-transposed to (in, 4H))
    wih0 = 0.1 * jax.random.normal(ks[0], (IN_DIM, 4 * HIDDEN), jnp.float32)
    wih1 = 0.1 * jax.random.normal(ks[1], (HIDDEN, 4 * HIDDEN), jnp.float32)
    whh = 0.1 * jax.random.normal(ks[2], (NUM_LAYERS, HIDDEN, 4 * HIDDEN), jnp.float32)
    b = 0.1 * jax.random.normal(ks[3], (NUM_LAYERS, 4 * HIDDEN), jnp.float32)  # b_ih + b_hh
    wa0 = 0.1 * jax.random.normal(ks[4], (HIDDEN, ACTOR_H1), jnp.float32)
    ba0 = 0.1 * jax.random.normal(ks[5], (1, ACTOR_H1), jnp.float32)
    wa1 = 0.1 * jax.random.normal(ks[6], (ACTOR_H1, ACTOR_H2), jnp.float32)
    ba1 = 0.1 * jax.random.normal(ks[7], (1, ACTOR_H2), jnp.float32)
    wa2 = 0.1 * jax.random.normal(ks[8], (ACTOR_H2, NUM_ACTIONS), jnp.float32)
    ba2 = 0.1 * jax.random.normal(ks[9], (1, NUM_ACTIONS), jnp.float32)
    params = (wih0, wih1, whh, b, wa0, ba0, wa1, ba1, wa2, ba2)

    # observations for a T-step rollout and (non-zero h, zero c) initial state
    x = jax.random.normal(ks[10], (T, B, IN_DIM), jnp.float32)
    h = 0.2 * jax.random.normal(ks[11], (NUM_LAYERS, B, HIDDEN), jnp.float32)
    c = jnp.zeros((NUM_LAYERS, B, HIDDEN), jnp.float32)   # buffer starts at zero

    w_slab, b_slab = pack_params(params)                   # one-time host-side pack
    state = jnp.concatenate([h, c], axis=0)                # [h0, h1, c0, c1]

    act, new_state = policy_lstm_rollout(x, state, w_slab, b_slab)
    jax.block_until_ready((act, new_state))

    # tight check vs a reference that mirrors the kernel's bf16 operand rounding
    ref_act_q, ref_h_q, ref_c_q = reference_rollout(x, h, c, params, quantize=True)
    assert jnp.allclose(act, ref_act_q, atol=5e-3), "action mismatch (bf16-mirrored ref)"
    assert jnp.allclose(new_state[:NUM_LAYERS], ref_h_q, atol=5e-3), "hidden mismatch"
    assert jnp.allclose(new_state[NUM_LAYERS:], ref_c_q, atol=5e-3), "cell mismatch"

    # loose sanity check vs the true f32 module numerics (bf16 weight slab)
    ref_act, ref_h, ref_c = reference_rollout(x, h, c, params, quantize=False)
    assert jnp.allclose(act, ref_act, atol=1e-1), "action drift vs f32 reference"
    assert jnp.allclose(new_state[:NUM_LAYERS], ref_h, atol=1e-1), "hidden drift"
    assert jnp.allclose(new_state[NUM_LAYERS:], ref_c, atol=1e-1), "cell drift"

    print("KERNEL_OK")
</pallas_src>

<mosaic_0001>
module attributes {stable_mosaic.version = 11 : i64} {
  func.func @policy_lstm_kernel(%arg0: i32, %arg1: memref<1x64x48xf32, #tpu.memory_space<vmem>>, %arg2: memref<4x64x32xf32, #tpu.memory_space<vmem>>, %arg3: memref<304x128xbf16, #tpu.memory_space<vmem>>, %arg4: memref<8x128xf32, #tpu.memory_space<vmem>>, %arg5: memref<1x64x128xf32, #tpu.memory_space<vmem>>, %arg6: memref<4x64x32xf32, #tpu.memory_space<vmem>>, %arg7: memref<4x64x32xf32, #tpu.memory_space<vmem>>) attributes {dimension_semantics = [#tpu.dimension_semantics<arbitrary>], iteration_bounds = array<i64: 8>, scalar_prefetch = 0 : i64, scratch_operands = 1 : i64, tpu.core_type = #tpu.core_type<tc>, window_params = [{transform_indices = @transform_0, window_bounds = array<i64: 1, 64, 48>}, {pipeline_mode = #tpu.pipeline_mode<synchronous>, transform_indices = @transform_1, window_bounds = array<i64: 4, 64, 32>}, {pipeline_mode = #tpu.pipeline_mode<synchronous>, transform_indices = @transform_2, window_bounds = array<i64: 304, 128>}, {pipeline_mode = #tpu.pipeline_mode<synchronous>, transform_indices = @transform_3, window_bounds = array<i64: 8, 128>}, {transform_indices = @transform_4, window_bounds = array<i64: 1, 64, 128>}, {pipeline_mode = #tpu.pipeline_mode<synchronous>, transform_indices = @transform_5, window_bounds = array<i64: 4, 64, 32>}]} {
    %c0_i32 = arith.constant 0 : i32
    %0 = arith.cmpi eq, %arg0, %c0_i32 : i32
    %1 = arith.extui %0 : i1 to i32
    %c0_i32_0 = arith.constant 0 : i32
    %2 = arith.cmpi ne, %1, %c0_i32_0 : i32
    scf.if %2 {
      %c0_59 = arith.constant 0 : index
      %c0_60 = arith.constant 0 : index
      %c0_61 = arith.constant 0 : index
      %117 = vector.load %arg2[%c0_59, %c0_60, %c0_61] : memref<4x64x32xf32, #tpu.memory_space<vmem>>, vector<4x64x32xf32>
      %c0_62 = arith.constant 0 : index
      %c0_63 = arith.constant 0 : index
      %c0_64 = arith.constant 0 : index
      %118 = vector.load %arg7[%c0_62, %c0_63, %c0_64] : memref<4x64x32xf32, #tpu.memory_space<vmem>>, vector<4x64x32xf32>
      tpu.vector_store %arg7[%c0_62, %c0_63, %c0_64], %117 {strides = array<i32>} : memref<4x64x32xf32, #tpu.memory_space<vmem>>, vector<4x64x32xf32>,
    } else {
    }
    %c0 = arith.constant 0 : index
    %c0_1 = arith.constant 0 : index
    %c0_2 = arith.constant 0 : index
    %3 = vector.load %arg1[%c0, %c0_1, %c0_2] : memref<1x64x48xf32, #tpu.memory_space<vmem>>, vector<1x64x48xf32>
    %4 = vector.shape_cast %3 : vector<1x64x48xf32> to vector<64x48xf32>
    %c0_3 = arith.constant 0 : index
    %c0_4 = arith.constant 0 : index
    %c0_5 = arith.constant 0 : index
    %5 = vector.load %arg7[%c0_3, %c0_4, %c0_5] : memref<4x64x32xf32, #tpu.memory_space<vmem>>, vector<1x64x32xf32>
    %6 = vector.shape_cast %5 : vector<1x64x32xf32> to vector<64x32xf32>
    %c1 = arith.constant 1 : index
    %c0_6 = arith.constant 0 : index
    %c0_7 = arith.constant 0 : index
    %7 = vector.load %arg7[%c1, %c0_6, %c0_7] : memref<4x64x32xf32, #tpu.memory_space<vmem>>, vector<1x64x32xf32>
    %8 = vector.shape_cast %7 : vector<1x64x32xf32> to vector<64x32xf32>
    %c2 = arith.constant 2 : index
    %c0_8 = arith.constant 0 : index
    %c0_9 = arith.constant 0 : index
    %9 = vector.load %arg7[%c2, %c0_8, %c0_9] : memref<4x64x32xf32, #tpu.memory_space<vmem>>, vector<1x64x32xf32>
    %10 = vector.shape_cast %9 : vector<1x64x32xf32> to vector<64x32xf32>
    %c3 = arith.constant 3 : index
    %c0_10 = arith.constant 0 : index
    %c0_11 = arith.constant 0 : index
    %11 = vector.load %arg7[%c3, %c0_10, %c0_11] : memref<4x64x32xf32, #tpu.memory_space<vmem>>, vector<1x64x32xf32>
    %12 = vector.shape_cast %11 : vector<1x64x32xf32> to vector<64x32xf32>
    %13 = arith.truncf %4 : vector<64x48xf32> to vector<64x48xbf16>
    %c0_12 = arith.constant 0 : index
    %c0_13 = arith.constant 0 : index
    %14 = vector.load %arg3[%c0_12, %c0_13] : memref<304x128xbf16, #tpu.memory_space<vmem>>, vector<48x128xbf16>
    %cst = arith.constant dense<0.000000e+00> : vector<64x128xf32>
    %15 = tpu.matmul %13, %14, %cst {dimension_numbers = #tpu.dot_dimension_numbers<[1], [0], [0], [1], [0, 0, 1, 1], [], []>} : vector<64x48xbf16>, vector<48x128xbf16>, vector<64x128xf32> -> vector<64x128xf32>
    %16 = arith.truncf %6 : vector<64x32xf32> to vector<64x32xbf16>
    %c48 = arith.constant 48 : index
    %c0_14 = arith.constant 0 : index
    %17 = vector.load %arg3[%c48, %c0_14] : memref<304x128xbf16, #tpu.memory_space<vmem>>, vector<32x128xbf16>
    %cst_15 = arith.constant dense<0.000000e+00> : vector<64x128xf32>
    %18 = tpu.matmul %16, %17, %cst_15 {dimension_numbers = #tpu.dot_dimension_numbers<[1], [0], [0], [1], [0, 0, 1, 1], [], []>} : vector<64x32xbf16>, vector<32x128xbf16>, vector<64x128xf32> -> vector<64x128xf32>
    %19 = arith.addf %15, %18 : vector<64x128xf32>
    %c0_16 = arith.constant 0 : index
    %c0_17 = arith.constant 0 : index
    %20 = vector.load %arg4[%c0_16, %c0_17] : memref<8x128xf32, #tpu.memory_space<vmem>>, vector<1x128xf32>
    %21 = vector.broadcast %20 : vector<1x128xf32> to vector<64x128xf32>
    %22 = arith.addf %19, %21 : vector<64x128xf32>
    %23 = arith.negf %22 : vector<64x128xf32>
    %24 = math.exp %23 : vector<64x128xf32>
    %cst_18 = arith.constant 1.000000e+00 : f32
    %25 = vector.broadcast %cst_18 : f32 to vector<64x128xf32>
    %26 = arith.addf %25, %24 : vector<64x128xf32>
    %27 = arith.divf %25, %26 : vector<64x128xf32>
    %28 = math.tanh %22 : vector<64x128xf32>
    %29 = vector.extract_strided_slice %27 {offsets = [0, 0], sizes = [64, 32], strides = [1, 1]} : vector<64x128xf32> to vector<64x32xf32>
    %30 = vector.extract_strided_slice %27 {offsets = [0, 32], sizes = [64, 32], strides = [1, 1]} : vector<64x128xf32> to vector<64x32xf32>
    %31 = vector.extract_strided_slice %28 {offsets = [0, 64], sizes = [64, 32], strides = [1, 1]} : vector<64x128xf32> to vector<64x32xf32>
    %32 = vector.extract_strided_slice %27 {offsets = [0, 96], sizes = [64, 32], strides = [1, 1]} : vector<64x128xf32> to vector<64x32xf32>
    %33 = arith.mulf %30, %10 : vector<64x32xf32>
    %34 = arith.mulf %29, %31 : vector<64x32xf32>
    %35 = arith.addf %33, %34 : vector<64x32xf32>
    %36 = math.tanh %35 : vector<64x32xf32>
    %37 = arith.mulf %32, %36 : vector<64x32xf32>
    %38 = arith.truncf %37 : vector<64x32xf32> to vector<64x32xbf16>
    %c80 = arith.constant 80 : index
    %c0_19 = arith.constant 0 : index
    %39 = vector.load %arg3[%c80, %c0_19] : memref<304x128xbf16, #tpu.memory_space<vmem>>, vector<32x128xbf16>
    %cst_20 = arith.constant dense<0.000000e+00> : vector<64x128xf32>
    %40 = tpu.matmul %38, %39, %cst_20 {dimension_numbers = #tpu.dot_dimension_numbers<[1], [0], [0], [1], [0, 0, 1, 1], [], []>} : vector<64x32xbf16>, vector<32x128xbf16>, vector<64x128xf32> -> vector<64x128xf32>
    %41 = arith.truncf %8 : vector<64x32xf32> to vector<64x32xbf16>
    %c112 = arith.constant 112 : index
    %c0_21 = arith.constant 0 : index
    %42 = vector.load %arg3[%c112, %c0_21] : memref<304x128xbf16, #tpu.memory_space<vmem>>, vector<32x128xbf16>
    %cst_22 = arith.constant dense<0.000000e+00> : vector<64x128xf32>
    %43 = tpu.matmul %41, %42, %cst_22 {dimension_numbers = #tpu.dot_dimension_numbers<[1], [0], [0], [1], [0, 0, 1, 1], [], []>} : vector<64x32xbf16>, vector<32x128xbf16>, vector<64x128xf32> -> vector<64x128xf32>
    %44 = arith.addf %40, %43 : vector<64x128xf32>
    %c1_23 = arith.constant 1 : index
    %c0_24 = arith.constant 0 : index
    %45 = vector.load %arg4[%c1_23, %c0_24] : memref<8x128xf32, #tpu.memory_space<vmem>>, vector<1x128xf32>
    %46 = vector.broadcast %45 : vector<1x128xf32> to vector<64x128xf32>
    %47 = arith.addf %44, %46 : vector<64x128xf32>
    %48 = arith.negf %47 : vector<64x128xf32>
    %49 = math.exp %48 : vector<64x128xf32>
    %cst_25 = arith.constant 1.000000e+00 : f32
    %50 = vector.broadcast %cst_25 : f32 to vector<64x128xf32>
    %51 = arith.addf %50, %49 : vector<64x128xf32>
    %52 = arith.divf %50, %51 : vector<64x128xf32>
    %53 = math.tanh %47 : vector<64x128xf32>
    %54 = vector.extract_strided_slice %52 {offsets = [0, 0], sizes = [64, 32], strides = [1, 1]} : vector<64x128xf32> to vector<64x32xf32>
    %55 = vector.extract_strided_slice %52 {offsets = [0, 32], sizes = [64, 32], strides = [1, 1]} : vector<64x128xf32> to vector<64x32xf32>
    %56 = vector.extract_strided_slice %53 {offsets = [0, 64], sizes = [64, 32], strides = [1, 1]} : vector<64x128xf32> to vector<64x32xf32>
    %57 = vector.extract_strided_slice %52 {offsets = [0, 96], sizes = [64, 32], strides = [1, 1]} : vector<64x128xf32> to vector<64x32xf32>
    %58 = arith.mulf %55, %12 : vector<64x32xf32>
    %59 = arith.mulf %54, %56 : vector<64x32xf32>
    %60 = arith.addf %58, %59 : vector<64x32xf32>
    %61 = math.tanh %60 : vector<64x32xf32>
    %62 = arith.mulf %57, %61 : vector<64x32xf32>
    %63 = arith.truncf %62 : vector<64x32xf32> to vector<64x32xbf16>
    %c144 = arith.constant 144 : index
    %c0_26 = arith.constant 0 : index
    %64 = vector.load %arg3[%c144, %c0_26] : memref<304x128xbf16, #tpu.memory_space<vmem>>, vector<32x128xbf16>
    %cst_27 = arith.constant dense<0.000000e+00> : vector<64x128xf32>
    %65 = tpu.matmul %63, %64, %cst_27 {dimension_numbers = #tpu.dot_dimension_numbers<[1], [0], [0], [1], [0, 0, 1, 1], [], []>} : vector<64x32xbf16>, vector<32x128xbf16>, vector<64x128xf32> -> vector<64x128xf32>
    %c2_28 = arith.constant 2 : index
    %c0_29 = arith.constant 0 : index
    %66 = vector.load %arg4[%c2_28, %c0_29] : memref<8x128xf32, #tpu.memory_space<vmem>>, vector<1x128xf32>
    %67 = vector.broadcast %66 : vector<1x128xf32> to vector<64x128xf32>
    %68 = arith.addf %65, %67 : vector<64x128xf32>
    %cst_30 = arith.constant 0.000000e+00 : f32
    %69 = vector.broadcast %cst_30 : f32 to vector<64x128xf32>
    %70 = arith.cmpf ogt, %68, %69 : vector<64x128xf32>
    %cst_31 = arith.constant 0.000000e+00 : f32
    %71 = vector.broadcast %cst_31 : f32 to vector<64x128xf32>
    %72 = arith.minimumf %68, %71 : vector<64x128xf32>
    %73 = math.exp %72 : vector<64x128xf32>
    %cst_32 = arith.constant 1.000000e+00 : f32
    %74 = vector.broadcast %cst_32 : f32 to vector<64x128xf32>
    %75 = arith.subf %73, %74 : vector<64x128xf32>
    %76 = arith.select %70, %68, %75 : vector<64x128xi1>, vector<64x128xf32>
    %77 = vector.extract_strided_slice %76 {offsets = [0, 0], sizes = [64, 64], strides = [1, 1]} : vector<64x128xf32> to vector<64x64xf32>
    %78 = arith.truncf %77 : vector<64x64xf32> to vector<64x64xbf16>
    %c176 = arith.constant 176 : index
    %c0_33 = arith.constant 0 : index
    %79 = vector.load %arg3[%c176, %c0_33] : memref<304x128xbf16, #tpu.memory_space<vmem>>, vector<64x128xbf16>
    %cst_34 = arith.constant dense<0.000000e+00> : vector<64x128xf32>
    %80 = tpu.matmul %78, %79, %cst_34 {dimension_numbers = #tpu.dot_dimension_numbers<[1], [0], [0], [1], [0, 0, 1, 1], [], []>} : vector<64x64xbf16>, vector<64x128xbf16>, vector<64x128xf32> -> vector<64x128xf32>
    %c3_35 = arith.constant 3 : index
    %c0_36 = arith.constant 0 : index
    %81 = vector.load %arg4[%c3_35, %c0_36] : memref<8x128xf32, #tpu.memory_space<vmem>>, vector<1x128xf32>
    %82 = vector.broadcast %81 : vector<1x128xf32> to vector<64x128xf32>
    %83 = arith.addf %80, %82 : vector<64x128xf32>
    %cst_37 = arith.constant 0.000000e+00 : f32
    %84 = vector.broadcast %cst_37 : f32 to vector<64x128xf32>
    %85 = arith.cmpf ogt, %83, %84 : vector<64x128xf32>
    %cst_38 = arith.constant 0.000000e+00 : f32
    %86 = vector.broadcast %cst_38 : f32 to vector<64x128xf32>
    %87 = arith.minimumf %83, %86 : vector<64x128xf32>
    %88 = math.exp %87 : vector<64x128xf32>
    %cst_39 = arith.constant 1.000000e+00 : f32
    %89 = vector.broadcast %cst_39 : f32 to vector<64x128xf32>
    %90 = arith.subf %88, %89 : vector<64x128xf32>
    %91 = arith.select %85, %83, %90 : vector<64x128xi1>, vector<64x128xf32>
    %92 = vector.extract_strided_slice %91 {offsets = [0, 0], sizes = [64, 64], strides = [1, 1]} : vector<64x128xf32> to vector<64x64xf32>
    %93 = arith.truncf %92 : vector<64x64xf32> to vector<64x64xbf16>
    %c240 = arith.constant 240 : index
    %c0_40 = arith.constant 0 : index
    %94 = vector.load %arg3[%c240, %c0_40] : memref<304x128xbf16, #tpu.memory_space<vmem>>, vector<64x128xbf16>
    %cst_41 = arith.constant dense<0.000000e+00> : vector<64x128xf32>
    %95 = tpu.matmul %93, %94, %cst_41 {dimension_numbers = #tpu.dot_dimension_numbers<[1], [0], [0], [1], [0, 0, 1, 1], [], []>} : vector<64x64xbf16>, vector<64x128xbf16>, vector<64x128xf32> -> vector<64x128xf32>
    %c4 = arith.constant 4 : index
    %c0_42 = arith.constant 0 : index
    %96 = vector.load %arg4[%c4, %c0_42] : memref<8x128xf32, #tpu.memory_space<vmem>>, vector<1x128xf32>
    %97 = vector.broadcast %96 : vector<1x128xf32> to vector<64x128xf32>
    %98 = arith.addf %95, %97 : vector<64x128xf32>
    %c0_43 = arith.constant 0 : index
    %c0_44 = arith.constant 0 : index
    %c0_45 = arith.constant 0 : index
    %99 = vector.load %arg5[%c0_43, %c0_44, %c0_45] : memref<1x64x128xf32, #tpu.memory_space<vmem>>, vector<1x64x128xf32>
    %100 = vector.shape_cast %99 : vector<1x64x128xf32> to vector<64x128xf32>
    %101 = vector.shape_cast %98 : vector<64x128xf32> to vector<1x64x128xf32>
    tpu.vector_store %arg5[%c0_43, %c0_44, %c0_45], %101 {strides = array<i32>} : memref<1x64x128xf32, #tpu.memory_space<vmem>>, vector<1x64x128xf32>,
    %c0_46 = arith.constant 0 : index
    %c0_47 = arith.constant 0 : index
    %c0_48 = arith.constant 0 : index
    %102 = vector.load %arg7[%c0_46, %c0_47, %c0_48] : memref<4x64x32xf32, #tpu.memory_space<vmem>>, vector<1x64x32xf32>
    %103 = vector.shape_cast %102 : vector<1x64x32xf32> to vector<64x32xf32>
    %104 = vector.shape_cast %37 : vector<64x32xf32> to vector<1x64x32xf32>
    tpu.vector_store %arg7[%c0_46, %c0_47, %c0_48], %104 {strides = array<i32>} : memref<4x64x32xf32, #tpu.memory_space<vmem>>, vector<1x64x32xf32>,
    %c1_49 = arith.constant 1 : index
    %c0_50 = arith.constant 0 : index
    %c0_51 = arith.constant 0 : index
    %105 = vector.load %arg7[%c1_49, %c0_50, %c0_51] : memref<4x64x32xf32, #tpu.memory_space<vmem>>, vector<1x64x32xf32>
    %106 = vector.shape_cast %105 : vector<1x64x32xf32> to vector<64x32xf32>
    %107 = vector.shape_cast %62 : vector<64x32xf32> to vector<1x64x32xf32>
    tpu.vector_store %arg7[%c1_49, %c0_50, %c0_51], %107 {strides = array<i32>} : memref<4x64x32xf32, #tpu.memory_space<vmem>>, vector<1x64x32xf32>,
    %c2_52 = arith.constant 2 : index
    %c0_53 = arith.constant 0 : index
    %c0_54 = arith.constant 0 : index
    %108 = vector.load %arg7[%c2_52, %c0_53, %c0_54] : memref<4x64x32xf32, #tpu.memory_space<vmem>>, vector<1x64x32xf32>
    %109 = vector.shape_cast %108 : vector<1x64x32xf32> to vector<64x32xf32>
    %110 = vector.shape_cast %35 : vector<64x32xf32> to vector<1x64x32xf32>
    tpu.vector_store %arg7[%c2_52, %c0_53, %c0_54], %110 {strides = array<i32>} : memref<4x64x32xf32, #tpu.memory_space<vmem>>, vector<1x64x32xf32>,
    %c3_55 = arith.constant 3 : index
    %c0_56 = arith.constant 0 : index
    %c0_57 = arith.constant 0 : index
    %111 = vector.load %arg7[%c3_55, %c0_56, %c0_57] : memref<4x64x32xf32, #tpu.memory_space<vmem>>, vector<1x64x32xf32>
    %112 = vector.shape_cast %111 : vector<1x64x32xf32> to vector<64x32xf32>
    %113 = vector.shape_cast %60 : vector<64x32xf32> to vector<1x64x32xf32>
    tpu.vector_store %arg7[%c3_55, %c0_56, %c0_57], %113 {strides = array<i32>} : memref<4x64x32xf32, #tpu.memory_space<vmem>>, vector<1x64x32xf32>,
    %c7_i32 = arith.constant 7 : i32
    %114 = arith.cmpi eq, %arg0, %c7_i32 : i32
    %115 = arith.extui %114 : i1 to i32
    %c0_i32_58 = arith.constant 0 : i32
    %116 = arith.cmpi ne, %115, %c0_i32_58 : i32
    scf.if %116 {
      %c0_59 = arith.constant 0 : index
      %c0_60 = arith.constant 0 : index
      %c0_61 = arith.constant 0 : index
      %117 = vector.load %arg7[%c0_59, %c0_60, %c0_61] : memref<4x64x32xf32, #tpu.memory_space<vmem>>, vector<4x64x32xf32>
      %c0_62 = arith.constant 0 : index
      %c0_63 = arith.constant 0 : index
      %c0_64 = arith.constant 0 : index
      %118 = vector.load %arg6[%c0_62, %c0_63, %c0_64] : memref<4x64x32xf32, #tpu.memory_space<vmem>>, vector<4x64x32xf32>
      tpu.vector_store %arg6[%c0_62, %c0_63, %c0_64], %117 {strides = array<i32>} : memref<4x64x32xf32, #tpu.memory_space<vmem>>, vector<4x64x32xf32>,
    } else {
    }
    return
  }
  func.func @transform_0(%arg0: i32) -> (i32, i32, i32) {
    %c0_i32 = arith.constant 0 : i32
    %c0_i32_0 = arith.constant 0 : i32
    %c0_i32_1 = arith.constant 0 : i32
    return %arg0, %c0_i32, %c0_i32_0 : i32, i32, i32
  }
  func.func @transform_1(%arg0: i32) -> (i32, i32, i32) {
    %c0_i32 = arith.constant 0 : i32
    %c0_i32_0 = arith.constant 0 : i32
    %c0_i32_1 = arith.constant 0 : i32
    %c0_i32_2 = arith.constant 0 : i32
    return %c0_i32, %c0_i32_0, %c0_i32_1 : i32, i32, i32
  }
  func.func @transform_2(%arg0: i32) -> (i32, i32) {
    %c0_i32 = arith.constant 0 : i32
    %c0_i32_0 = arith.constant 0 : i32
    %c0_i32_1 = arith.constant 0 : i32
    return %c0_i32, %c0_i32_0 : i32, i32
  }
  func.func @transform_3(%arg0: i32) -> (i32, i32) {
    %c0_i32 = arith.constant 0 : i32
    %c0_i32_0 = arith.constant 0 : i32
    %c0_i32_1 = arith.constant 0 : i32
    return %c0_i32, %c0_i32_0 : i32, i32
  }
  func.func @transform_4(%arg0: i32) -> (i32, i32, i32) {
    %c0_i32 = arith.constant 0 : i32
    %c0_i32_0 = arith.constant 0 : i32
    %c0_i32_1 = arith.constant 0 : i32
    return %arg0, %c0_i32, %c0_i32_0 : i32, i32, i32
  }
  func.func @transform_5(%arg0: i32) -> (i32, i32, i32) {
    %c0_i32 = arith.constant 0 : i32
    %c0_i32_0 = arith.constant 0 : i32
    %c0_i32_1 = arith.constant 0 : i32
    %c0_i32_2 = arith.constant 0 : i32
    return %c0_i32, %c0_i32_0, %c0_i32_1 : i32, i32, i32
  }
}

</mosaic_0001>

<bundles_post_ra>
// kernel: policy_lstm_rollout.1
= control target key start
LH: loop header
LB: loop body
LE: loop exit
PB: predicated region body
PF: predicated region fallthrough
CT: control target
= control target key end

     0   :  { %s2459_s18 = smov 0   ;;  %s3154_s0 = inlined_call_operand.vmem [shape: f32[8,64,48], index: 0, kind: input, shape index: {}]   ;;  %s3155_s1 = inlined_call_operand.vmem [shape: f32[4,64,32], index: 1, kind: input, shape index: {}, may-alias: {1,5}]   ;;  %s3156_s2 = inlined_call_operand.vmem [shape: bf16[304,128], index: 2, kind: input, shape index: {}]   ;;  %s3157_s3 = inlined_call_operand.vmem [shape: f32[8,128], index: 3, kind: input, shape index: {}]   ;;  %s3158_s4 = inlined_call_operand.vmem [shape: f32[8,64,128], index: 4, kind: output, shape index: {0}]   ;;  %s3159_s5 = inlined_call_operand.vmem [shape: f32[4,64,32], index: 5, kind: output, shape index: {1}, may-alias: {1,5}]  }
   0x1 LB: > { %s2465_s19 = sadd.s32 4294967295, %s2424_s18   ;;  %p1968_p0 = scmp.ge.s32.totalorder %s2424_s18, 1  ;;  %s2424_s18 = sphi %s2459_s18, %s16_s18  }
   0x2   : > { %p185_p1 = scmp.lt.s32.totalorder %s2424_s18, 9 }
   0x4   : > { %p186_p2 = pnand %p1968_p0, %p185_p1 }
   0x5   : > { %p213_p3 = scmp.lt.s32.totalorder (!%p186_p2), %s2465_s19, 7  ;;  %p1973_p4 = scmp.ne.s32.totalorder (!%p186_p2), %s2465_s19, 0 }
   0x6   : > { %189 = sbr.rel (%p186_p2) target bundleno = 2197 (0x895), region = 36 }
   0xd   : > { %s214_s20 = scalar_select %p213_p3, %s2465_s19, 7 }
   0xe   : > { %227 = sbr.rel (%p1973_p4) target bundleno = 31 (0x1f), region = 40  ;;  %v228_v0 = vld [vmem:[%s3155_s1] sm:$0xff] (!%p1973_p4)  ;;  %vm260_vm0 = vcmask (!%p1973_p4), 261120   ;;  %v229_v1 = vld [vmem:[%s3155_s1 + $0x8] sm:$0xff] (!%p1973_p4)  ;;  %v230_v2 = vld [vmem:[%s3155_s1 + $0x10] sm:$0xff] (!%p1973_p4) }
   0xf   : > { %s2061_s21 = sshll.u32 %s214_s20, 6  ;;  %261 = vst.msk [vmem:[#allocation2] sm:$0xff] (!%p1973_p4), %vm260_vm0, %v228_v0  ;;  %262 = vst.msk [vmem:[#allocation2 + $0x8] sm:$0xff] (!%p1973_p4), %vm260_vm0, %v229_v1  ;;  %v231_v3 = vld [vmem:[%s3155_s1 + $0x18] sm:$0xff] (!%p1973_p4)  ;;  %v232_v4 = vld [vmem:[%s3155_s1 + $0x20] sm:$0xff] (!%p1973_p4) }
  0x10   : > { %s2474_s24 = scalar_lea.vmem %s3154_s0, %s2061_s21  ;;  %s2479_s27 = scalar_lea.vmem %s3158_s4, %s2061_s21  ;;  %263 = vst.msk [vmem:[#allocation2 + $0x10] sm:$0xff] (!%p1973_p4), %vm260_vm0, %v230_v2  ;;  %v233_v5 = vld [vmem:[%s3155_s1 + $0x28] sm:$0xff] (!%p1973_p4)  ;;  %264 = vst.msk [vmem:[#allocation2 + $0x18] sm:$0xff] (!%p1973_p4), %vm260_vm0, %v231_v3  ;;  %v234_v6 = vld [vmem:[%s3155_s1 + $0x30] sm:$0xff] (!%p1973_p4) }
  0x11   : > { %265 = vst.msk [vmem:[#allocation2 + $0x20] sm:$0xff] (!%p1973_p4), %vm260_vm0, %v232_v4  ;;  %266 = vst.msk [vmem:[#allocation2 + $0x28] sm:$0xff] (!%p1973_p4), %vm260_vm0, %v233_v5  ;;  %v235_v7 = vld [vmem:[%s3155_s1 + $0x38] sm:$0xff] (!%p1973_p4)  ;;  %v236_v8 = vld [vmem:[%s3155_s1 + $0x40] sm:$0xff] (!%p1973_p4) }
  0x12   : > { %267 = vst.msk [vmem:[#allocation2 + $0x30] sm:$0xff] (!%p1973_p4), %vm260_vm0, %v234_v6  ;;  %268 = vst.msk [vmem:[#allocation2 + $0x38] sm:$0xff] (!%p1973_p4), %vm260_vm0, %v235_v7  ;;  %v237_v9 = vld [vmem:[%s3155_s1 + $0x48] sm:$0xff] (!%p1973_p4)  ;;  %v238_v10 = vld [vmem:[%s3155_s1 + $0x50] sm:$0xff] (!%p1973_p4) }
  0x13   : > { %269 = vst.msk [vmem:[#allocation2 + $0x40] sm:$0xff] (!%p1973_p4), %vm260_vm0, %v236_v8  ;;  %v239_v11 = vld [vmem:[%s3155_s1 + $0x58] sm:$0xff] (!%p1973_p4)  ;;  %270 = vst.msk [vmem:[#allocation2 + $0x48] sm:$0xff] (!%p1973_p4), %vm260_vm0, %v237_v9  ;;  %v240_v12 = vld [vmem:[%s3155_s1 + $0x60] sm:$0xff] (!%p1973_p4) }
  0x14   : > { %271 = vst.msk [vmem:[#allocation2 + $0x50] sm:$0xff] (!%p1973_p4), %vm260_vm0, %v238_v10  ;;  %272 = vst.msk [vmem:[#allocation2 + $0x58] sm:$0xff] (!%p1973_p4), %vm260_vm0, %v239_v11  ;;  %v241_v13 = vld [vmem:[%s3155_s1 + $0x68] sm:$0xff] (!%p1973_p4)  ;;  %v242_v14 = vld [vmem:[%s3155_s1 + $0x70] sm:$0xff] (!%p1973_p4) }
  0x15   : > { %273 = vst.msk [vmem:[#allocation2 + $0x60] sm:$0xff] %vm260_vm0, %v240_v12  ;;  %274 = vst.msk [vmem:[#allocation2 + $0x68] sm:$0xff] %vm260_vm0, %v241_v13  ;;  %v243_v15 = vld [vmem:[%s3155_s1 + $0x78] sm:$0xff]  ;;  %v244_v16 = vld [vmem:[%s3155_s1 + $0x80] sm:$0xff] }
  0x16   : > { %275 = vst.msk [vmem:[#allocation2 + $0x70] sm:$0xff] %vm260_vm0, %v242_v14  ;;  %v245_v17 = vld [vmem:[%s3155_s1 + $0x88] sm:$0xff]  ;;  %276 = vst.msk [vmem:[#allocation2 + $0x78] sm:$0xff] %vm260_vm0, %v243_v15  ;;  %v246_v18 = vld [vmem:[%s3155_s1 + $0x90] sm:$0xff] }
  0x17   : > { %277 = vst.msk [vmem:[#allocation2 + $0x80] sm:$0xff] %vm260_vm0, %v244_v16  ;;  %278 = vst.msk [vmem:[#allocation2 + $0x88] sm:$0xff] %vm260_vm0, %v245_v17  ;;  %v247_v19 = vld [vmem:[%s3155_s1 + $0x98] sm:$0xff]  ;;  %v248_v20 = vld [vmem:[%s3155_s1 + $0xa0] sm:$0xff] }
  0x18   : > { %279 = vst.msk [vmem:[#allocation2 + $0x90] sm:$0xff] %vm260_vm0, %v246_v18  ;;  %280 = vst.msk [vmem:[#allocation2 + $0x98] sm:$0xff] %vm260_vm0, %v247_v19  ;;  %v249_v21 = vld [vmem:[%s3155_s1 + $0xa8] sm:$0xff]  ;;  %v250_v22 = vld [vmem:[%s3155_s1 + $0xb0] sm:$0xff] }
  0x19   : > { %281 = vst.msk [vmem:[#allocation2 + $0xa0] sm:$0xff] %vm260_vm0, %v248_v20  ;;  %v251_v23 = vld [vmem:[%s3155_s1 + $0xb8] sm:$0xff]  ;;  %282 = vst.msk [vmem:[#allocation2 + $0xa8] sm:$0xff] %vm260_vm0, %v249_v21  ;;  %v252_v24 = vld [vmem:[%s3155_s1 + $0xc0] sm:$0xff] }
  0x1a   : > { %283 = vst.msk [vmem:[#allocation2 + $0xb0] sm:$0xff] %vm260_vm0, %v250_v22  ;;  %284 = vst.msk [vmem:[#allocation2 + $0xb8] sm:$0xff] %vm260_vm0, %v251_v23  ;;  %v253_v25 = vld [vmem:[%s3155_s1 + $0xc8] sm:$0xff]  ;;  %v254_v26 = vld [vmem:[%s3155_s1 + $0xd0] sm:$0xff] }
  0x1b   : > { %285 = vst.msk [vmem:[#allocation2 + $0xc0] sm:$0xff] %vm260_vm0, %v252_v24  ;;  %286 = vst.msk [vmem:[#allocation2 + $0xc8] sm:$0xff] %vm260_vm0, %v253_v25  ;;  %v255_v27 = vld [vmem:[%s3155_s1 + $0xd8] sm:$0xff]  ;;  %v256_v28 = vld [vmem:[%s3155_s1 + $0xe0] sm:$0xff] }
  0x1c   : > { %287 = vst.msk [vmem:[#allocation2 + $0xd0] sm:$0xff] %vm260_vm0, %v254_v26  ;;  %v257_v29 = vld [vmem:[%s3155_s1 + $0xe8] sm:$0xff]  ;;  %288 = vst.msk [vmem:[#allocation2 + $0xd8] sm:$0xff] %vm260_vm0, %v255_v27  ;;  %v258_v30 = vld [vmem:[%s3155_s1 + $0xf0] sm:$0xff] }
  0x1d   : > { %289 = vst.msk [vmem:[#allocation2 + $0xe0] sm:$0xff] %vm260_vm0, %v256_v28  ;;  %290 = vst.msk [vmem:[#allocation2 + $0xe8] sm:$0xff] %vm260_vm0, %v257_v29  ;;  %v259_v31 = vld [vmem:[%s3155_s1 + $0xf8] sm:$0xff] }
  0x1e   : > { %291 = vst.msk [vmem:[#allocation2 + $0xf0] sm:$0xff] %vm260_vm0, %v258_v30  ;;  %292 = vst.msk [vmem:[#allocation2 + $0xf8] sm:$0xff] %vm260_vm0, %v259_v31 }
  0x1f PF: > { %v2239_v32 = vld [vmem:[%s3156_s2 + $0x18] sm:$0xff]   ;;  %v2240_v33 = vld [vmem:[%s3156_s2 + $0x20] sm:$0xff]   ;;  %vm366_vm1 = vcmask 261120   ;;  %v2242_v44 = vld [vmem:[%s3156_s2 + $0x8] sm:$0xff]   ;;  %vm462_vm2 = vcmask 392192   ;;  %s2427_s16 = smov 32  }
  0x20   : > { %2110 = vmatprep.subr.bf16.mxu0 %v2239_v32  ;;  %v301_v34 = vld [vmem:[#allocation2] sm:$0xff]  ;;  %v302_v35 = vld [vmem:[#allocation2 + $0x8] sm:$0xff]  ;;  %v2243_v47 = vld [vmem:[%s3156_s2 + $0x10] sm:$0xff]   ;;  %s2428_s10 = smov 96   ;;  %vm1423_vm7 = vcmask 523264   ;;  %p2058_p5 = scmp.ne.s32.totalorder %s2465_s19, 7 }
  0x21   : > { %v303_v36 = vld [vmem:[#allocation2 + $0x10] sm:$0xff]  ;;  %2111 = vmatpush3.bf16.msra.mxu0 %v2239_v32  ;;  %v346_v37 = vpack.c.bf16 %v302_v35, %v301_v34  ;;  %v304_v38 = vld [vmem:[#allocation2 + $0x18] sm:$0xff]  ;;  %v2241_v39 = vld [vmem:[%s3156_s2] sm:$0xff]  }
  0x22   : > { %2112 = vmatprep.subr.bf16.mxu0 %v2240_v33  ;;  %v305_v40 = vld [vmem:[#allocation2 + $0x20] sm:$0xff]  ;;  %v306_v41 = vld [vmem:[#allocation2 + $0x28] sm:$0xff]  ;;  %v347_v42 = vpack.c.bf16 %v304_v38, %v303_v36  ;;  %v295_v52 = vld [vmem:[%s2474_s24 + $0x10] sm:$0xff] }
  0x23   : > { %2114 = vmatprep.mubr.msk.bf16.mxu0 %vm366_vm1, %v346_v37  ;;  %v348_v43 = vpack.c.bf16 %v306_v41, %v305_v40  ;;  %v307_v45 = vld [vmem:[#allocation2 + $0x30] sm:$0xff]  ;;  %v308_v46 = vld [vmem:[#allocation2 + $0x38] sm:$0xff]  ;;  %v293_v48 = vld [vmem:[%s2474_s24] sm:$0xff] }
  0x24   : > { %v294_v49 = vld [vmem:[%s2474_s24 + $0x8] sm:$0xff]  ;;  %v349_v50 = vpack.c.bf16 %v308_v46, %v307_v45  ;;  %v296_v53 = vld [vmem:[%s2474_s24 + $0x18] sm:$0xff]  ;;  %v297_v54 = vld [vmem:[%s2474_s24 + $0x20] sm:$0xff] }
  0x25   : > { %2113 = vmatpush3.bf16.msra.mxu0 %v2240_v33  ;;  %v336_v51 = vpack.c.bf16 %v294_v49, %v293_v48  ;;  %v298_v55 = vld [vmem:[%s2474_s24 + $0x28] sm:$0xff]  ;;  %v337_v56 = vpack.c.bf16 %v296_v53, %v295_v52  ;;  %v299_v58 = vld [vmem:[%s2474_s24 + $0x30] sm:$0xff]  ;;  %v300_v59 = vld [vmem:[%s2474_s24 + $0x38] sm:$0xff]  ;;  %s2426_s24 = smov 64  }
  0x26   : > { %2122 = vmatprep.subr.bf16.mxu0 %v2241_v39  ;;  %v338_v57 = vpack.c.bf16 %v298_v55, %v297_v54  ;;  %v339_v60 = vpack.c.bf16 %v300_v59, %v299_v58  ;;  %v1987_v61 = vld [vmem:[%s3157_s3] ss:$0 sm:$0xff]  ;;  %v321_v22 = vld [vmem:[#allocation2 + $0x90] sm:$0xff]  ;;  %v320_v24 = vld [vmem:[#allocation2 + $0x88] sm:$0xff] }
  0x27   : > { %v319_v20 = vld [vmem:[#allocation2 + $0x80] sm:$0xff]  ;;  %v322_v26 = vld [vmem:[#allocation2 + $0x98] sm:$0xff]  ;;  %v324_v27 = vld [vmem:[#allocation2 + $0xa8] sm:$0xff] }
  0x28   : > { %2115 = vmatmul.mubr.msk.bf16.vlgmr.msra.gmra.mrb[0].mxu0 %vm366_vm1, %v347_v42  ;;  %v323_v25 = vld [vmem:[#allocation2 + $0xa0] sm:$0xff] }
  0x29   : > { %2123 = vmatpush3.bf16.msra.mxu0 %v2241_v39  ;;  %2118 = vmatprep.mubr.msk.bf16.mxu0 %vm366_vm1, %v348_v43 }
  0x2a   : > { %2124 = vmatprep.subr.bf16.mxu0 %v2242_v44 }
  0x2d   : > { %2125 = vmatpush3.bf16.msra.mxu0 %v2242_v44 }
  0x2e   : > { %2126 = vmatprep.subr.bf16.mxu0 %v2243_v47 }
  0x30   : > { %2119 = vmatmul.mubr.msk.bf16.gmra.mrb[4].mxu0 %vm366_vm1, %v349_v50 }
  0x31   : > { %2127 = vmatpush3.bf16.msra.mxu0 %v2243_v47  ;;  %2128 = vmatprep.mubr.msk.bf16.mxu0 %vm462_vm2, %v336_v51 }
  0x38   : > { %2129 = vmatmul.mubr.msk.bf16.vlgmr.msra.gmra.mrb[0].mxu0 %vm462_vm2, %v337_v56 }
  0x39   : > { %2132 = vmatprep.mubr.msk.bf16.mxu0 %vm462_vm2, %v338_v57 }
  0x40   : > { %2133 = vmatmul.mubr.msk.bf16.gmra.mrb[4].mxu0 %vm462_vm2, %v339_v60 }
 0x10b   : > { %v2130_v62 = vpop.f32.mrb[0].mxu0 }
 0x10c   : > { %v547_v63 = vadd.f32 %v2130_v62, %v1987_v61  ;;  %v509_v0 = vpop.f32.mrb[1].mxu0  ;;  %v325_v62 = vld [vmem:[#allocation2 + $0xb0] sm:$0xff] }
 0x10d   : > { %v545_v1 = vadd.f32 %v1987_v61, %v509_v0  ;;  %v2131_v2 = vpop.f32.mrb[2].mxu0 }
 0x10e   : > { %2258 = vtanh.f32 %v547_v63  ;;  %v512_v3 = vpop.f32.mrb[3].mxu0  ;;  %v548_v4 = vadd.f32 %v2131_v2, %v1987_v61  ;;  %v1990_v28 = vmul.f32 -1.442695, %v547_v63 }
 0x10f   : > { %2260 = vtanh.f32 %v545_v1  ;;  %v546_v5 = vadd.f32 %v1987_v61, %v512_v3  ;;  %v1988_v29 = vmul.f32 -1.442695, %v545_v1 }
 0x110   : > { %2262 = vtanh.f32 %v548_v4  ;;  %v1991_v30 = vmul.f32 -1.442695, %v548_v4  ;;  %v326_v4 = vld [vmem:[#allocation2 + $0xb8] sm:$0xff] }
 0x111   : > { %2264 = vtanh.f32 %v546_v5  ;;  %v1989_v31 = vmul.f32 -1.442695, %v546_v5 }
 0x113   : > { %v2134_v6 = vpop.f32.mrb[4].mxu0 }
 0x114   : > { %v525_v7 = vpop.f32.mrb[5].mxu0  ;;  %v551_v13 = vadd.f32 %v2134_v6, %v1987_v61 }
 0x115   : > { %v549_v8 = vadd.f32 %v1987_v61, %v525_v7  ;;  %v2135_v9 = vpop.f32.mrb[6].mxu0 }
 0x116   : > { %v528_v10 = vpop.f32.mrb[7].mxu0  ;;  %v552_v17 = vadd.f32 %v2135_v9, %v1987_v61  ;;  %v1994_v34 = vmul.f32 -1.442695, %v551_v13 }
 0x117   : > { %2266 = vtanh.f32 %v549_v8  ;;  %v550_v14 = vadd.f32 %v1987_v61, %v528_v10  ;;  %v1992_v32 = vmul.f32 -1.442695, %v549_v8 }
 0x118   : > { %v2259_v11 = vpop.eup %2258  ;;  %2268 = vtanh.f32 %v551_v13  ;;  %v1995_v39 = vmul.f32 -1.442695, %v552_v17 }
 0x119   : > { %v2261_v12 = vpop.eup %2260  ;;  %661 = vrot.lane.b32.xlu1 %v2259_v11, %s2426_s24  ;;  %2270 = vtanh.f32 %v550_v14  ;;  %v1993_v37 = vmul.f32 -1.442695, %v550_v14 }
 0x11a   : > { %657 = vrot.lane.b32.xlu0 %v2261_v12, %s2426_s24  ;;  %v2263_v15 = vpop.eup %2262  ;;  %2272 = vtanh.f32 %v552_v17 }
 0x11b   : > { %v2265_v16 = vpop.eup %2264  ;;  %2274 = vpow2.f32 %v1990_v28 }
 0x11c   : > { %2276 = vpow2.f32 %v1988_v29 }
 0x11d   : > { %663 = vrot.lane.b32.xlu1 %v2263_v15, %s2426_s24  ;;  %2278 = vpow2.f32 %v1991_v30 }
 0x11e   : > { %659 = vrot.lane.b32.xlu0 %v2265_v16, %s2426_s24  ;;  %2280 = vpow2.f32 %v1989_v31 }
 0x11f   : > { %2282 = vpow2.f32 %v1992_v32 }
 0x120   : > { %2284 = vpow2.f32 %v1994_v34 }
 0x121   : > { %v2267_v18 = vpop.eup %2266 }
 0x122   : > { %665 = vrot.lane.b32.xlu0 %v2267_v18, %s2426_s24  ;;  %v2269_v19 = vpop.eup %2268 }
 0x123   : > { %v2271_v21 = vpop.eup %2270 }
 0x124   : > { %667 = vrot.lane.b32.xlu1 %v2271_v21, %s2426_s24  ;;  %v2273_v23 = vpop.eup %2272 }
 0x125   : > { %v2275_v33 = vpop.eup %2274 }
 0x126   : > { %669 = vrot.lane.b32.xlu0 %v2269_v19, %s2426_s24  ;;  %v579_v35 = vadd.f32 1.0, %v2275_v33  ;;  %v2277_v36 = vpop.eup %2276 }
 0x127   : > { %v2279_v38 = vpop.eup %2278  ;;  %v577_v40 = vadd.f32 1.0, %v2277_v36 }
 0x128   : > { %671 = vrot.lane.b32.xlu1 %v2273_v23, %s2426_s24  ;;  %2286 = vrcp.f32 %v579_v35  ;;  %v580_v41 = vadd.f32 1.0, %v2279_v38  ;;  %v2281_v42 = vpop.eup %2280 }
 0x129   : > { %2288 = vpow2.f32 %v1993_v37  ;;  %v2283_v43 = vpop.eup %2282  ;;  %v578_v44 = vadd.f32 1.0, %v2281_v42 }
 0x12a   : > { %617 = vrot.lane.b32.xlu0 %v319_v20, %s2427_s16  ;;  %2290 = vpow2.f32 %v1995_v39  ;;  %v581_v45 = vadd.f32 1.0, %v2283_v43  ;;  %v2285_v46 = vpop.eup %2284 }
 0x12b   : > { %2292 = vrcp.f32 %v577_v40  ;;  %v583_v52 = vadd.f32 1.0, %v2285_v46 }
 0x12c   : > { %619 = vrot.lane.b32.xlu1 %v320_v24, %s2427_s16  ;;  %2294 = vrcp.f32 %v580_v41 }
 0x12d   : > { %2296 = vrcp.f32 %v578_v44 }
 0x12e   : > { %621 = vrot.lane.b32.xlu0 %v321_v22, %s2427_s16  ;;  %2298 = vrcp.f32 %v581_v45 }
 0x12f   : > { %2300 = vrcp.f32 %v583_v52  ;;  %v2244_v52 = vld [vmem:[%s3156_s2 + $0x38] sm:$0xff]  }
 0x130   : > { %623 = vrot.lane.b32.xlu1 %v322_v26, %s2427_s16  ;;  %2136 = vmatprep.subr.bf16.mxu1 %v2244_v52 }
 0x131   : > { %2137 = vmatpush3.bf16.msra.mxu1 %v2244_v52 }
 0x132   : > { %625 = vrot.lane.b32.xlu0 %v323_v25, %s2427_s16  ;;  %v2658_v47 = vpop.eup %2286 }
 0x133   : > { %v2289_v49 = vpop.eup %2288 }
 0x134   : > { %627 = vrot.lane.b32.xlu1 %v324_v27, %s2427_s16  ;;  %v2291_v53 = vpop.eup %2290  ;;  %v582_v55 = vadd.f32 1.0, %v2289_v49 }
 0x135   : > { %v2662_v54 = vpop.eup %2292  ;;  %v584_v61 = vadd.f32 1.0, %v2291_v53  ;;  %v2245_v53 = vld [vmem:[%s3156_s2 + $0x40] sm:$0xff]  }
 0x136   : > { %v2664_v56 = vpop.eup %2294  ;;  %2302 = vrcp.f32 %v582_v55  ;;  %v310_v55 = vld [vmem:[#allocation2 + $0x40] sm:$0xff]  ;;  %2138 = vmatprep.subr.bf16.mxu1 %v2245_v53 }
 0x137   : > { %v2670_v63 = vpop.eup %2296  ;;  %2304 = vrcp.f32 %v584_v61  ;;  %v313_v61 = vld [vmem:[#allocation2 + $0x58] sm:$0xff]  ;;  %2139 = vmatpush3.bf16.msra.mxu1 %v2245_v53 }
 0x138   : > { %v2674_v2 = vpop.eup %2298 }
 0x139   : > { %v2679_v6 = vpop.eup %2300 }
 0x140   : > { %v2683_v8 = vpop.eup %2302 }
 0x141   : > { %v2688_v11 = vpop.eup %2304 }
 0x18b   : > { %v662_v48 = vpop.permute.xlu1 %661 }
 0x18c   : > { %v683_v50 = vmul.f32 %v2658_v47, %v662_v48  ;;  %v658_v51 = vpop.permute.xlu0 %657 }
 0x18d   : > { %v681_v57 = vmul.f32 %v2662_v54, %v658_v51 }
 0x18e   : > { %701 = vrot.lane.b32.xlu0 %v683_v50, %s2427_s16 }
 0x18f   : > { %v664_v58 = vpop.permute.xlu1 %663 }
 0x190   : > { %v684_v59 = vmul.f32 %v2664_v56, %v664_v58  ;;  %v660_v60 = vpop.permute.xlu0 %659 }
 0x191   : > { %v682_v0 = vmul.f32 %v2670_v63, %v660_v60  ;;  %v312_v60 = vld [vmem:[#allocation2 + $0x50] sm:$0xff] }
 0x192   : > { %697 = vrot.lane.b32.xlu0 %v681_v57, %s2427_s16  ;;  %703 = vrot.lane.b32.xlu1 %v684_v59, %s2427_s16  ;;  %v311_v57 = vld [vmem:[#allocation2 + $0x48] sm:$0xff] }
 0x193   : > { %v785_v59 = vpack.c.bf16 %v311_v57, %v310_v55 }
 0x194   : > { %v666_v1 = vpop.permute.xlu0 %665 }
 0x195   : > { %v685_v3 = vmul.f32 %v2674_v2, %v666_v1  ;;  %2140 = vmatprep.mubr.msk.bf16.mxu1 %vm366_vm1, %v785_v59  ;;  %v314_v1 = vld [vmem:[#allocation2 + $0x60] sm:$0xff] }
 0x196   : > { %629 = vrot.lane.b32.xlu0 %v325_v62, %s2427_s16  ;;  %699 = vrot.lane.b32.xlu1 %v682_v0, %s2427_s16  ;;  %v668_v9 = vpop.permute.xlu1 %667  ;;  %v2246_v0 = vld [vmem:[%s3156_s2 + $0x28] sm:$0xff]  }
 0x197   : > { %v686_v10 = vmul.f32 %v2683_v8, %v668_v9  ;;  %2148 = vmatprep.subr.bf16.mxu1 %v2246_v0  ;;  %v2247_v9 = vld [vmem:[%s3156_s2 + $0x30] sm:$0xff]  }
 0x198   : > { %v670_v5 = vpop.permute.xlu0 %669 }
 0x199   : > { %v687_v7 = vmul.f32 %v2679_v6, %v670_v5 }
 0x19a   : > { %705 = vrot.lane.b32.xlu0 %v685_v3, %s2427_s16  ;;  %631 = vrot.lane.b32.xlu1 %v326_v4, %s2427_s16  ;;  %v672_v12 = vpop.permute.xlu1 %671  ;;  %v315_v3 = vld [vmem:[#allocation2 + $0x68] sm:$0xff]  ;;  %v786_v4 = vpack.c.bf16 %v313_v61, %v312_v60 }
 0x19b   : > { %v688_v13 = vmul.f32 %v2688_v11, %v672_v12  ;;  %v787_v5 = vpack.c.bf16 %v315_v3, %v314_v1  ;;  %v317_v12 = vld [vmem:[#allocation2 + $0x78] sm:$0xff]  ;;  %v328_v1 = vld [vmem:[#allocation2 + $0xc0] sm:$0xff] }
 0x19c   : > { %v618_v14 = vpop.permute.xlu0 %617  ;;  %2141 = vmatmul.mubr.msk.bf16.vlgmr.msra.gmra.mrb[0].mxu1 %vm366_vm1, %v786_v4  ;;  %v330_v4 = vld [vmem:[#allocation2 + $0xd0] sm:$0xff] }
 0x19d   : > { %v641_v21 = vmul.f32 %v2662_v54, %v618_v14  ;;  %2149 = vmatpush3.bf16.msra.mxu1 %v2246_v0  ;;  %2144 = vmatprep.mubr.msk.bf16.mxu1 %vm366_vm1, %v787_v5 }
 0x19e   : > { %709 = vrot.lane.b32.xlu0 %v687_v7, %s2427_s16  ;;  %707 = vrot.lane.b32.xlu1 %v686_v10, %s2427_s16  ;;  %v620_v15 = vpop.permute.xlu1 %619  ;;  %v316_v10 = vld [vmem:[#allocation2 + $0x70] sm:$0xff] }
 0x19f   : > { %v642_v27 = vmul.f32 %v2670_v63, %v620_v15  ;;  %2150 = vmatprep.subr.bf16.mxu1 %v2247_v9 }
 0x1a0   : > { %v622_v16 = vpop.permute.xlu0 %621 }
 0x1a1   : > { %v643_v23 = vmul.f32 %v2658_v47, %v622_v16  ;;  %2151 = vmatpush3.bf16.msra.mxu1 %v2247_v9  ;;  %v329_v9 = vld [vmem:[#allocation2 + $0xc8] sm:$0xff] }
 0x1a2   : > { %711 = vrot.lane.b32.xlu1 %v688_v13, %s2427_s16  ;;  %v624_v17 = vpop.permute.xlu1 %623  ;;  %v788_v13 = vpack.c.bf16 %v317_v12, %v316_v10  ;;  %v331_v10 = vld [vmem:[#allocation2 + $0xd8] sm:$0xff]  ;;  %v333_v12 = vld [vmem:[#allocation2 + $0xe8] sm:$0xff] }
 0x1a3   : > { %v644_v30 = vmul.f32 %v2664_v56, %v624_v17 }
 0x1a4   : > { %v626_v18 = vpop.permute.xlu0 %625  ;;  %2145 = vmatmul.mubr.msk.bf16.gmra.mrb[4].mxu1 %vm366_vm1, %v788_v13 }
 0x1a5   : > { %v645_v32 = vmul.f32 %v2674_v2, %v626_v18 }
 0x1a6   : > { %v628_v20 = vpop.permute.xlu1 %627 }
 0x1a7   : > { %v646_v40 = vmul.f32 %v2683_v8, %v628_v20 }
 0x200   : > { %v702_v19 = vpop.permute.xlu0 %701 }
 0x201   : > { %v2696_v26 = vadd.f32 %v702_v19, %v643_v23 }
 0x204   : > { %v698_v22 = vpop.permute.xlu0 %697  ;;  %v704_v25 = vpop.permute.xlu1 %703 }
 0x205   : > { %v2694_v24 = vadd.f32 %v698_v22, %v641_v21  ;;  %v2705_v33 = vadd.f32 %v704_v25, %v644_v30 }
 0x207   : > { %2306 = vtanh.f32 %v2694_v24 }
 0x208   : > { %v630_v28 = vpop.permute.xlu0 %629  ;;  %v700_v29 = vpop.permute.xlu1 %699  ;;  %2308 = vtanh.f32 %v2696_v26 }
 0x209   : > { %v2701_v31 = vadd.f32 %v700_v29, %v642_v27  ;;  %v647_v37 = vmul.f32 %v2679_v6, %v630_v28 }
 0x20b   : > { %2310 = vtanh.f32 %v2701_v31 }
 0x20c   : > { %v706_v34 = vpop.permute.xlu0 %705  ;;  %v632_v36 = vpop.permute.xlu1 %631 }
 0x20d   : > { %v2708_v35 = vadd.f32 %v706_v34, %v645_v32  ;;  %v648_v45 = vmul.f32 %v2688_v11, %v632_v36 }
 0x20f   : > { %2312 = vtanh.f32 %v2708_v35 }
 0x210   : > { %2314 = vtanh.f32 %v2705_v33  ;;  %v710_v38 = vpop.permute.xlu0 %709  ;;  %v708_v42 = vpop.permute.xlu1 %707 }
 0x211   : > { %v2307_v39 = vpop.eup %2306  ;;  %v2714_v41 = vadd.f32 %v710_v38, %v647_v37  ;;  %v2718_v43 = vadd.f32 %v708_v42, %v646_v40 }
 0x212   : > { %745 = vrot.lane.b32.xlu0 %v2307_v39, %s2426_s24  ;;  %v2309_v44 = vpop.eup %2308 }
 0x213   : > { %2316 = vtanh.f32 %v2714_v41 }
 0x214   : > { %2318 = vtanh.f32 %v2718_v43  ;;  %v712_v48 = vpop.permute.xlu1 %711 }
 0x215   : > { %v2311_v46 = vpop.eup %2310  ;;  %v2723_v49 = vadd.f32 %v712_v48, %v648_v45 }
 0x216   : > { %749 = vrot.lane.b32.xlu0 %v2309_v44, %s2426_s24  ;;  %747 = vrot.lane.b32.xlu1 %v2311_v46, %s2426_s24 }
 0x217   : > { %2320 = vtanh.f32 %v2723_v49 }
 0x219   : > { %v2313_v50 = vpop.eup %2312 }
 0x21a   : > { %v2315_v51 = vpop.eup %2314  ;;  %753 = vrot.lane.b32.xlu0 %v2313_v50, %s2426_s24 }
 0x21b   : > { %751 = vrot.lane.b32.xlu1 %v2315_v51, %s2426_s24 }
 0x21d   : > { %v2317_v58 = vpop.eup %2316 }
 0x21e   : > { %757 = vrot.lane.b32.xlu0 %v2317_v58, %s2426_s24  ;;  %v2319_v62 = vpop.eup %2318 }
 0x21f   : > { %755 = vrot.lane.b32.xlu1 %v2319_v62, %s2426_s24 }
 0x221   : > { %v2321_v7 = vpop.eup %2320 }
 0x223   : > { %759 = vrot.lane.b32.xlu1 %v2321_v7, %s2426_s24  ;;  %v332_v7 = vld [vmem:[#allocation2 + $0xe0] sm:$0xff] }
 0x284   : > { %v746_v14 = vpop.permute.xlu0 %745 }
 0x285   : > { %v2749_v17 = vmul.f32 %v2662_v54, %v746_v14 }
 0x288   : > { %v750_v15 = vpop.permute.xlu0 %749  ;;  %v748_v16 = vpop.permute.xlu1 %747 }
 0x289   : > { %v2752_v18 = vmul.f32 %v2670_v63, %v748_v16  ;;  %v2757_v21 = vmul.f32 %v2658_v47, %v750_v15 }
 0x28b   : > { %v777_v19 = vpack.c.bf16 %v2752_v18, %v2749_v17 }
 0x28c   : > { %v754_v22 = vpop.permute.xlu0 %753 }
 0x28d   : > { %v752_v20 = vpop.permute.xlu1 %751  ;;  %886 = vrot.lane.b32.xlu0 %v777_v19, %s2427_s16  ;;  %v2767_v63 = vmul.f32 %v2674_v2, %v754_v22 }
 0x28e   : > { %v2760_v23 = vmul.f32 %v2664_v56, %v752_v20 }
 0x290   : > { %v778_v54 = vpack.c.bf16 %v2760_v23, %v2757_v21  ;;  %v758_v47 = vpop.permute.xlu0 %757 }
 0x291   : > { %v756_v25 = vpop.permute.xlu1 %755  ;;  %v2775_v29 = vmul.f32 %v2679_v6, %v758_v47 }
 0x292   : > { %888 = vrot.lane.b32.xlu1 %v778_v54, %s2427_s16  ;;  %v2770_v27 = vmul.f32 %v2683_v8, %v756_v25 }
 0x294   : > { %v779_v28 = vpack.c.bf16 %v2770_v27, %v2767_v63 }
 0x295   : > { %v760_v56 = vpop.permute.xlu1 %759 }
 0x296   : > { %v2778_v30 = vmul.f32 %v2688_v11, %v760_v56  ;;  %890 = vrot.lane.b32.xlu0 %v779_v28, %s2427_s16  ;;  %v2008_v11 = vld [vmem:[%s3157_s3 + $0x1] ss:$0 sm:$0xff] }
 0x298   : > { %v780_v2 = vpack.c.bf16 %v2778_v30, %v2775_v29 }
 0x29a   : > { %892 = vrot.lane.b32.xlu1 %v780_v2, %s2427_s16 }
 0x2ff   : > { %v887_v8 = vpop.permute.xlu0 %886 }
 0x300   : > { %2152 = vmatprep.mubr.msk.bf16.mxu1 %vm366_vm1, %v887_v8 }
 0x304   : > { %v889_v32 = vpop.permute.xlu1 %888 }
 0x305   : > { %2153 = vmatmul.mubr.msk.bf16.vlgmr.msra.gmra.mrb[0].mxu1 %vm366_vm1, %v889_v32 }
 0x308   : > { %v891_v34 = vpop.permute.xlu0 %890 }
 0x309   : > { %2156 = vmatprep.mubr.msk.bf16.mxu1 %vm366_vm1, %v891_v34 }
 0x30c   : > { %v893_v6 = vpop.permute.xlu1 %892 }
 0x30d   : > { %2157 = vmatmul.mubr.msk.bf16.gmra.mrb[4].mxu1 %vm366_vm1, %v893_v6 }
 0x3d8   : > { %v2154_v36 = vpop.f32.mrb[0].mxu1 }
 0x3d9   : > { %v952_v37 = vpop.f32.mrb[1].mxu1  ;;  %v990_v42 = vadd.f32 %v2154_v36, %v2008_v11 }
 0x3da   : > { %v988_v38 = vadd.f32 %v2008_v11, %v952_v37  ;;  %v2155_v39 = vpop.f32.mrb[2].mxu1 }
 0x3db   : > { %v955_v40 = vpop.f32.mrb[3].mxu1  ;;  %v991_v46 = vadd.f32 %v2155_v39, %v2008_v11  ;;  %v2011_v13 = vmul.f32 -1.442695, %v990_v42 }
 0x3dc   : > { %2322 = vtanh.f32 %v988_v38  ;;  %v989_v44 = vadd.f32 %v2008_v11, %v955_v40  ;;  %v2009_v14 = vmul.f32 -1.442695, %v988_v38 }
 0x3dd   : > { %2324 = vtanh.f32 %v990_v42  ;;  %v2012_v15 = vmul.f32 -1.442695, %v991_v46 }
 0x3de   : > { %2326 = vtanh.f32 %v989_v44  ;;  %v2010_v16 = vmul.f32 -1.442695, %v989_v44 }
 0x3e0   : > { %v2158_v45 = vpop.f32.mrb[4].mxu1 }
 0x3e1   : > { %v968_v48 = vpop.f32.mrb[5].mxu1  ;;  %v994_v53 = vadd.f32 %v2158_v45, %v2008_v11 }
 0x3e2   : > { %v992_v50 = vadd.f32 %v2008_v11, %v968_v48  ;;  %v2159_v51 = vpop.f32.mrb[6].mxu1 }
 0x3e3   : > { %v971_v52 = vpop.f32.mrb[7].mxu1  ;;  %v995_v61 = vadd.f32 %v2159_v51, %v2008_v11  ;;  %v2015_v22 = vmul.f32 -1.442695, %v994_v53 }
 0x3e4   : > { %2328 = vtanh.f32 %v992_v50  ;;  %v993_v58 = vadd.f32 %v2008_v11, %v971_v52  ;;  %v2013_v19 = vmul.f32 -1.442695, %v992_v50 }
 0x3e5   : > { %2330 = vtanh.f32 %v991_v46  ;;  %v2016_v2 = vmul.f32 -1.442695, %v995_v61 }
 0x3e6   : > { %v2323_v55 = vpop.eup %2322  ;;  %2332 = vtanh.f32 %v994_v53  ;;  %v2014_v47 = vmul.f32 -1.442695, %v993_v58 }
 0x3e7   : > { %1100 = vrot.lane.b32.xlu0 %v2323_v55, %s2426_s24  ;;  %v2325_v57 = vpop.eup %2324  ;;  %2334 = vtanh.f32 %v993_v58 }
 0x3e8   : > { %v2327_v59 = vpop.eup %2326  ;;  %2336 = vtanh.f32 %v995_v61 }
 0x3e9   : > { %1102 = vrot.lane.b32.xlu1 %v2327_v59, %s2426_s24  ;;  %2338 = vpow2.f32 %v2011_v13  ;;  %v334_v59 = vld [vmem:[#allocation2 + $0xf0] sm:$0xff] }
 0x3ea   : > { %2340 = vpow2.f32 %v2009_v14 }
 0x3eb   : > { %1104 = vrot.lane.b32.xlu0 %v2325_v57, %s2426_s24  ;;  %2342 = vpow2.f32 %v2012_v15 }
 0x3ec   : > { %2344 = vpow2.f32 %v2010_v16 }
 0x3ed   : > { %2346 = vpow2.f32 %v2013_v19 }
 0x3ee   : > { %v2329_v60 = vpop.eup %2328  ;;  %2348 = vpow2.f32 %v2015_v22 }
 0x3ef   : > { %v2331_v62 = vpop.eup %2330  ;;  %1108 = vrot.lane.b32.xlu0 %v2329_v60, %s2426_s24 }
 0x3f0   : > { %1106 = vrot.lane.b32.xlu1 %v2331_v62, %s2426_s24  ;;  %v2333_v0 = vpop.eup %2332 }
 0x3f1   : > { %v2335_v3 = vpop.eup %2334 }
 0x3f2   : > { %v2337_v5 = vpop.eup %2336 }
 0x3f3   : > { %1112 = vrot.lane.b32.xlu0 %v2333_v0, %s2426_s24  ;;  %v2339_v20 = vpop.eup %2338 }
 0x3f4   : > { %1110 = vrot.lane.b32.xlu1 %v2335_v3, %s2426_s24  ;;  %v1022_v54 = vadd.f32 1.0, %v2339_v20  ;;  %v2341_v25 = vpop.eup %2340  ;;  %v335_v3 = vld [vmem:[#allocation2 + $0xf8] sm:$0xff] }
 0x3f5   : > { %v2343_v28 = vpop.eup %2342  ;;  %v1020_v56 = vadd.f32 1.0, %v2341_v25 }
 0x3f6   : > { %2350 = vrcp.f32 %v1022_v54  ;;  %v1023_v8 = vadd.f32 1.0, %v2343_v28  ;;  %v2345_v32 = vpop.eup %2344 }
 0x3f7   : > { %1060 = vrot.lane.b32.xlu0 %v328_v1, %s2427_s16  ;;  %2352 = vpow2.f32 %v2014_v47  ;;  %v2347_v34 = vpop.eup %2346  ;;  %v1021_v6 = vadd.f32 1.0, %v2345_v32 }
 0x3f8   : > { %1114 = vrot.lane.b32.xlu1 %v2337_v5, %s2426_s24  ;;  %2354 = vrcp.f32 %v1020_v56  ;;  %v1024_v36 = vadd.f32 1.0, %v2347_v34  ;;  %v2349_v37 = vpop.eup %2348 }
 0x3f9   : > { %2356 = vpow2.f32 %v2016_v2  ;;  %v1026_v44 = vadd.f32 1.0, %v2349_v37 }
 0x3fa   : > { %2358 = vrcp.f32 %v1023_v8 }
 0x3fb   : > { %1064 = vrot.lane.b32.xlu0 %v330_v4, %s2427_s16  ;;  %2360 = vrcp.f32 %v1021_v6 }
 0x3fc   : > { %1062 = vrot.lane.b32.xlu1 %v329_v9, %s2427_s16  ;;  %2362 = vrcp.f32 %v1024_v36 }
 0x3fd   : > { %2364 = vrcp.f32 %v1026_v44 }
 0x3ff   : > { %1068 = vrot.lane.b32.xlu0 %v332_v7, %s2427_s16 }
 0x400   : > { %1066 = vrot.lane.b32.xlu1 %v331_v10, %s2427_s16  ;;  %v2805_v38 = vpop.eup %2350 }
 0x401   : > { %v2353_v40 = vpop.eup %2352 }
 0x402   : > { %v2809_v46 = vpop.eup %2354  ;;  %v1025_v48 = vadd.f32 1.0, %v2353_v40 }
 0x403   : > { %v2357_v50 = vpop.eup %2356 }
 0x404   : > { %1070 = vrot.lane.b32.xlu1 %v333_v12, %s2427_s16  ;;  %v2812_v52 = vpop.eup %2358  ;;  %v1027_v57 = vadd.f32 1.0, %v2357_v50  ;;  %2366 = vrcp.f32 %v1025_v48 }
 0x405   : > { %v2817_v60 = vpop.eup %2360 }
 0x406   : > { %v2821_v62 = vpop.eup %2362  ;;  %2368 = vrcp.f32 %v1027_v57 }
 0x407   : > { %v2826_v5 = vpop.eup %2364 }
 0x40e   : > { %v2830_v9 = vpop.eup %2366 }
 0x410   : > { %v2835_v13 = vpop.eup %2368 }
 0x459   : > { %v1101_v11 = vpop.permute.xlu0 %1100 }
 0x45a   : > { %v1124_v51 = vmul.f32 %v2809_v46, %v1101_v11 }
 0x45b   : > { %v1103_v45 = vpop.permute.xlu1 %1102 }
 0x45c   : > { %v1125_v61 = vmul.f32 %v2817_v60, %v1103_v45 }
 0x45d   : > { %v1105_v39 = vpop.permute.xlu0 %1104 }
 0x45e   : > { %v1126_v42 = vmul.f32 %v2805_v38, %v1105_v39 }
 0x460   : > { %1144 = vrot.lane.b32.xlu0 %v1126_v42, %s2427_s16 }
 0x461   : > { %v1109_v58 = vpop.permute.xlu0 %1108 }
 0x462   : > { %v1107_v53 = vpop.permute.xlu1 %1106  ;;  %v1128_v0 = vmul.f32 %v2821_v62, %v1109_v58 }
 0x463   : > { %v1127_v55 = vmul.f32 %v2812_v52, %v1107_v53 }
 0x464   : > { %1140 = vrot.lane.b32.xlu0 %v1124_v51, %s2427_s16 }
 0x465   : > { %1146 = vrot.lane.b32.xlu1 %v1127_v55, %s2427_s16  ;;  %v1113_v1 = vpop.permute.xlu0 %1112 }
 0x466   : > { %v1111_v4 = vpop.permute.xlu1 %1110  ;;  %v1130_v7 = vmul.f32 %v2826_v5, %v1113_v1 }
 0x467   : > { %v1129_v10 = vmul.f32 %v2830_v9, %v1111_v4 }
 0x468   : > { %1072 = vrot.lane.b32.xlu0 %v334_v59, %s2427_s16 }
 0x469   : > { %1142 = vrot.lane.b32.xlu1 %v1125_v61, %s2427_s16  ;;  %v1061_v15 = vpop.permute.xlu0 %1060 }
 0x46a   : > { %v1115_v12 = vpop.permute.xlu1 %1114  ;;  %v1084_v47 = vmul.f32 %v2809_v46, %v1061_v15  ;;  %v2248_v15 = vld [vmem:[%s3156_s2 + $0x48] sm:$0xff]  }
 0x46b   : > { %v1131_v14 = vmul.f32 %v2835_v13, %v1115_v12  ;;  %2160 = vmatprep.subr.bf16.mxu0 %v2248_v15 }
 0x46c   : > { %1148 = vrot.lane.b32.xlu0 %v1128_v0, %s2427_s16  ;;  %2161 = vmatpush3.bf16.msra.mxu0 %v2248_v15 }
 0x46d   : > { %1074 = vrot.lane.b32.xlu1 %v335_v3, %s2427_s16  ;;  %v1065_v19 = vpop.permute.xlu0 %1064 }
 0x46e   : > { %v1063_v16 = vpop.permute.xlu1 %1062  ;;  %v1086_v56 = vmul.f32 %v2805_v38, %v1065_v19 }
 0x46f   : > { %v1085_v6 = vmul.f32 %v2817_v60, %v1063_v16  ;;  %v2249_v16 = vld [vmem:[%s3156_s2 + $0x50] sm:$0xff]  }
 0x470   : > { %1152 = vrot.lane.b32.xlu0 %v1130_v7, %s2427_s16  ;;  %2162 = vmatprep.subr.bf16.mxu0 %v2249_v16 }
 0x471   : > { %1150 = vrot.lane.b32.xlu1 %v1129_v10, %s2427_s16  ;;  %v1069_v22 = vpop.permute.xlu0 %1068  ;;  %2163 = vmatpush3.bf16.msra.mxu0 %v2249_v16 }
 0x472   : > { %v1067_v20 = vpop.permute.xlu1 %1066  ;;  %v1088_v37 = vmul.f32 %v2821_v62, %v1069_v22 }
 0x473   : > { %v1087_v36 = vmul.f32 %v2812_v52, %v1067_v20 }
 0x475   : > { %1154 = vrot.lane.b32.xlu1 %v1131_v14, %s2427_s16 }
 0x476   : > { %v1071_v25 = vpop.permute.xlu1 %1070 }
 0x477   : > { %v1089_v53 = vmul.f32 %v2830_v9, %v1071_v25 }
 0x4d2   : > { %v1145_v54 = vpop.permute.xlu0 %1144 }
 0x4d3   : > { %v2843_v32 = vadd.f32 %v1145_v54, %v1086_v56 }
 0x4d6   : > { %v1141_v28 = vpop.permute.xlu0 %1140 }
 0x4d7   : > { %v2841_v2 = vadd.f32 %v1141_v28, %v1084_v47  ;;  %v1147_v8 = vpop.permute.xlu1 %1146 }
 0x4d8   : > { %v2852_v42 = vadd.f32 %v1147_v8, %v1087_v36 }
 0x4d9   : > { %2370 = vtanh.f32 %v2841_v2 }
 0x4da   : > { %v1073_v34 = vpop.permute.xlu0 %1072  ;;  %2372 = vtanh.f32 %v2843_v32 }
 0x4db   : > { %v1143_v11 = vpop.permute.xlu1 %1142  ;;  %v1090_v48 = vmul.f32 %v2826_v5, %v1073_v34 }
 0x4dc   : > { %v2850_v39 = vadd.f32 %v1143_v11, %v1085_v6 }
 0x4de   : > { %v1149_v40 = vpop.permute.xlu0 %1148  ;;  %2374 = vtanh.f32 %v2850_v39 }
 0x4df   : > { %v2855_v44 = vadd.f32 %v1149_v40, %v1088_v37  ;;  %v1075_v45 = vpop.permute.xlu1 %1074 }
 0x4e0   : > { %v1091_v61 = vmul.f32 %v2835_v13, %v1075_v45 }
 0x4e1   : > { %2376 = vtanh.f32 %v2855_v44 }
 0x4e2   : > { %v1153_v50 = vpop.permute.xlu0 %1152  ;;  %2378 = vtanh.f32 %v2852_v42 }
 0x4e3   : > { %v2371_v51 = vpop.eup %2370  ;;  %v2861_v55 = vadd.f32 %v1153_v50, %v1090_v48  ;;  %v1151_v57 = vpop.permute.xlu1 %1150 }
 0x4e4   : > { %1188 = vrot.lane.b32.xlu0 %v2371_v51, %s2426_s24  ;;  %v2864_v58 = vadd.f32 %v1151_v57, %v1089_v53  ;;  %v2373_v59 = vpop.eup %2372 }
 0x4e5   : > { %2380 = vtanh.f32 %v2861_v55 }
 0x4e6   : > { %2382 = vtanh.f32 %v2864_v58 }
 0x4e7   : > { %v1155_v0 = vpop.permute.xlu1 %1154 }
 0x4e8   : > { %1192 = vrot.lane.b32.xlu0 %v2373_v59, %s2426_s24  ;;  %v2375_v1 = vpop.eup %2374  ;;  %v2870_v3 = vadd.f32 %v1155_v0, %v1091_v61 }
 0x4e9   : > { %1190 = vrot.lane.b32.xlu1 %v2375_v1, %s2426_s24 }
 0x4ea   : > { %2384 = vtanh.f32 %v2870_v3 }
 0x4eb   : > { %v2377_v4 = vpop.eup %2376 }
 0x4ec   : > { %1196 = vrot.lane.b32.xlu0 %v2377_v4, %s2426_s24  ;;  %v2379_v7 = vpop.eup %2378  ;;  %v2251_v4 = vld [vmem:[%s3156_s2 + $0x60] sm:$0xff]  }
 0x4ed   : > { %1194 = vrot.lane.b32.xlu1 %v2379_v7, %s2426_s24  ;;  %v2252_v7 = vld [vmem:[%s3156_s2 + $0x68] sm:$0xff]  }
 0x4ef   : > { %v2381_v10 = vpop.eup %2380 }
 0x4f0   : > { %1200 = vrot.lane.b32.xlu0 %v2381_v10, %s2426_s24  ;;  %v2383_v12 = vpop.eup %2382  ;;  %v2253_v10 = vld [vmem:[%s3156_s2 + $0x70] sm:$0xff]  }
 0x4f1   : > { %1198 = vrot.lane.b32.xlu1 %v2383_v12, %s2426_s24  ;;  %v2017_v12 = vld [vmem:[%s3157_s3 + $0x2] ss:$0 sm:$0xff] }
 0x4f4   : > { %v2385_v14 = vpop.eup %2384 }
 0x4f5   : > { %1202 = vrot.lane.b32.xlu1 %v2385_v14, %s2426_s24 }
 0x556   : > { %v1189_v19 = vpop.permute.xlu0 %1188 }
 0x557   : > { %v1212_v54 = vmul.f32 %v2809_v46, %v1189_v19 }
 0x55a   : > { %v1193_v20 = vpop.permute.xlu0 %1192 }
 0x55b   : > { %v1191_v22 = vpop.permute.xlu1 %1190  ;;  %v1214_v8 = vmul.f32 %v2805_v38, %v1193_v20 }
 0x55c   : > { %v1213_v25 = vmul.f32 %v2817_v60, %v1191_v22 }
 0x55e   : > { %v1220_v47 = vpack.c.bf16 %v1213_v25, %v1212_v54  ;;  %v1197_v56 = vpop.permute.xlu0 %1196 }
 0x55f   : > { %v1195_v28 = vpop.permute.xlu1 %1194  ;;  %v1216_v36 = vmul.f32 %v2821_v62, %v1197_v56 }
 0x560   : > { %v1215_v34 = vmul.f32 %v2812_v52, %v1195_v28  ;;  %1237 = vrot.lane.b32.xlu0 %v1220_v47, %s2427_s16 }
 0x562   : > { %v1221_v6 = vpack.c.bf16 %v1215_v34, %v1214_v8  ;;  %v1201_v46 = vpop.permute.xlu0 %1200 }
 0x563   : > { %v1199_v11 = vpop.permute.xlu1 %1198  ;;  %v1218_v45 = vmul.f32 %v2826_v5, %v1201_v46 }
 0x564   : > { %v1217_v37 = vmul.f32 %v2830_v9, %v1199_v11  ;;  %1239 = vrot.lane.b32.xlu1 %v1221_v6, %s2427_s16 }
 0x566   : > { %v1222_v40 = vpack.c.bf16 %v1217_v37, %v1216_v36 }
 0x567   : > { %v1203_v60 = vpop.permute.xlu1 %1202 }
 0x568   : > { %v1219_v48 = vmul.f32 %v2835_v13, %v1203_v60  ;;  %1241 = vrot.lane.b32.xlu0 %v1222_v40, %s2427_s16 }
 0x56a   : > { %v1223_v38 = vpack.c.bf16 %v1219_v48, %v1218_v45 }
 0x56c   : > { %1683 = vrot.lane.b32.xlu0 %v2749_v17, %s2427_s16  ;;  %1243 = vrot.lane.b32.xlu1 %v1223_v38, %s2427_s16 }
 0x570   : > { %1687 = vrot.lane.b32.xlu0 %v2757_v21, %s2427_s16  ;;  %1685 = vrot.lane.b32.xlu1 %v2752_v18, %s2427_s16 }
 0x574   : > { %1691 = vrot.lane.b32.xlu0 %v2767_v63, %s2427_s16  ;;  %1689 = vrot.lane.b32.xlu1 %v2760_v23, %s2427_s16 }
 0x578   : > { %1695 = vrot.lane.b32.xlu0 %v2775_v29, %s2427_s16  ;;  %1693 = vrot.lane.b32.xlu1 %v2770_v27, %s2427_s16 }
 0x57c   : > { %1723 = vrot.lane.b32.xlu0 %v1212_v54, %s2427_s16  ;;  %1697 = vrot.lane.b32.xlu1 %v2778_v30, %s2427_s16 }
 0x580   : > { %1727 = vrot.lane.b32.xlu0 %v1214_v8, %s2427_s16  ;;  %1725 = vrot.lane.b32.xlu1 %v1213_v25, %s2427_s16 }
 0x584   : > { %1731 = vrot.lane.b32.xlu0 %v1216_v36, %s2427_s16  ;;  %1729 = vrot.lane.b32.xlu1 %v1215_v34, %s2427_s16 }
 0x588   : > { %1735 = vrot.lane.b32.xlu0 %v1218_v45, %s2427_s16  ;;  %1733 = vrot.lane.b32.xlu1 %v1217_v37, %s2427_s16 }
 0x58c   : > { %1763 = vrot.lane.b32.xlu0 %v2694_v24, %s2428_s10  ;;  %1737 = vrot.lane.b32.xlu1 %v1219_v48, %s2427_s16 }
 0x590   : > { %1767 = vrot.lane.b32.xlu0 %v2696_v26, %s2428_s10  ;;  %1765 = vrot.lane.b32.xlu1 %v2701_v31, %s2428_s10 }
 0x594   : > { %1771 = vrot.lane.b32.xlu0 %v2708_v35, %s2428_s10  ;;  %1769 = vrot.lane.b32.xlu1 %v2705_v33, %s2428_s10 }
 0x598   : > { %1775 = vrot.lane.b32.xlu0 %v2714_v41, %s2428_s10  ;;  %1773 = vrot.lane.b32.xlu1 %v2718_v43, %s2428_s10 }
 0x59c   : > { %1803 = vrot.lane.b32.xlu0 %v2841_v2, %s2428_s10  ;;  %1777 = vrot.lane.b32.xlu1 %v2723_v49, %s2428_s10 }
 0x5a0   : > { %1807 = vrot.lane.b32.xlu0 %v2843_v32, %s2428_s10  ;;  %1805 = vrot.lane.b32.xlu1 %v2850_v39, %s2428_s10 }
 0x5a4   : > { %1811 = vrot.lane.b32.xlu0 %v2855_v44, %s2428_s10  ;;  %1809 = vrot.lane.b32.xlu1 %v2852_v42, %s2428_s10 }
 0x5a8   : > { %1815 = vrot.lane.b32.xlu0 %v2861_v55, %s2428_s10  ;;  %1813 = vrot.lane.b32.xlu1 %v2864_v58, %s2428_s10 }
 0x5ac   : > { %1817 = vrot.lane.b32.xlu1 %v2870_v3, %s2428_s10  ;;  %v2250_v3 = vld [vmem:[%s3156_s2 + $0x58] sm:$0xff]  }
 0x5ad   : > { %2172 = vmatprep.subr.bf16.mxu1 %v2250_v3 }
 0x5ae   : > { %2173 = vmatpush3.bf16.msra.mxu1 %v2250_v3 }
 0x5af   : > { %2174 = vmatprep.subr.bf16.mxu1 %v2251_v4 }
 0x5b2   : > { %2175 = vmatpush3.bf16.msra.mxu1 %v2251_v4  ;;  %v2254_v4 = vld [vmem:[%s3156_s2 + $0x78] sm:$0xff]  }
 0x5b3   : > { %2176 = vmatprep.subr.bf16.mxu1 %v2252_v7  ;;  %2188 = vmatprep.subr.bf16.mxu0 %v2254_v4 }
 0x5b6   : > { %2177 = vmatpush3.bf16.msra.mxu1 %v2252_v7  ;;  %v2255_v7 = vld [vmem:[%s3156_s2 + $0x80] sm:$0xff]  }
 0x5b7   : > { %2178 = vmatprep.subr.bf16.mxu1 %v2253_v10 }
 0x5ba   : > { %2179 = vmatpush3.bf16.msra.mxu1 %v2253_v10  ;;  %v2256_v10 = vld [vmem:[%s3156_s2 + $0x88] sm:$0xff]  }
 0x5bb   : > { %2204 = vmatprep.subr.bf16.mxu1 %v2254_v4 }
 0x5d2   : > { %v1238_v24 = vpop.permute.xlu0 %1237 }
 0x5d3   : > { %2164 = vmatprep.mubr.msk.bf16.mxu0 %vm366_vm1, %v1238_v24 }
 0x5d6   : > { %v1240_v26 = vpop.permute.xlu1 %1239 }
 0x5d7   : > { %2165 = vmatmul.mubr.msk.bf16.vlgmr.msra.gmra.mrb[8].mxu0 %vm366_vm1, %v1240_v26 }
 0x5d8   : > { %2189 = vmatpush3.bf16.msra.mxu0 %v2254_v4 }
 0x5d9   : > { %2190 = vmatprep.subr.bf16.mxu0 %v2255_v7 }
 0x5da   : > { %v1242_v31 = vpop.permute.xlu0 %1241 }
 0x5db   : > { %2168 = vmatprep.mubr.msk.bf16.mxu0 %vm366_vm1, %v1242_v31 }
 0x5dc   : > { %2191 = vmatpush3.bf16.msra.mxu0 %v2255_v7 }
 0x5dd   : > { %2192 = vmatprep.subr.bf16.mxu0 %v2256_v10 }
 0x5de   : > { %v1684_v33 = vpop.permute.xlu0 %1683  ;;  %v1244_v35 = vpop.permute.xlu1 %1243 }
 0x5df   : > { %1707 = vst.msk [vmem:[#allocation2] sm:$0xff] %vm366_vm1, %v1684_v33  ;;  %2169 = vmatmul.mubr.msk.bf16.gmra.mrb[12].mxu0 %vm366_vm1, %v1244_v35 }
 0x5e0   : > { %2193 = vmatpush3.bf16.msra.mxu0 %v2256_v10 }
 0x5e2   : > { %v1688_v41 = vpop.permute.xlu0 %1687  ;;  %v1686_v43 = vpop.permute.xlu1 %1685 }
 0x5e3   : > { %1709 = vst.msk [vmem:[#allocation2 + $0x10] sm:$0xff] %vm366_vm1, %v1688_v41  ;;  %1708 = vst.msk [vmem:[#allocation2 + $0x8] sm:$0xff] %vm366_vm1, %v1686_v43 }
 0x5e6   : > { %v1692_v49 = vpop.permute.xlu0 %1691  ;;  %v1690_v17 = vpop.permute.xlu1 %1689 }
 0x5e7   : > { %1711 = vst.msk [vmem:[#allocation2 + $0x20] sm:$0xff] %vm366_vm1, %v1692_v49  ;;  %1710 = vst.msk [vmem:[#allocation2 + $0x18] sm:$0xff] %vm366_vm1, %v1690_v17 }
 0x5ea   : > { %v1696_v18 = vpop.permute.xlu0 %1695  ;;  %v1694_v21 = vpop.permute.xlu1 %1693 }
 0x5eb   : > { %1713 = vst.msk [vmem:[#allocation2 + $0x30] sm:$0xff] %vm366_vm1, %v1696_v18  ;;  %1712 = vst.msk [vmem:[#allocation2 + $0x28] sm:$0xff] %vm366_vm1, %v1694_v21 }
 0x5ee   : > { %v1724_v23 = vpop.permute.xlu0 %1723  ;;  %v1698_v63 = vpop.permute.xlu1 %1697 }
 0x5ef   : > { %1747 = vst.msk [vmem:[#allocation2 + $0x40] sm:$0xff] %vm366_vm1, %v1724_v23  ;;  %1714 = vst.msk [vmem:[#allocation2 + $0x38] sm:$0xff] %vm366_vm1, %v1698_v63 }
 0x5f2   : > { %v1728_v27 = vpop.permute.xlu0 %1727  ;;  %v1726_v29 = vpop.permute.xlu1 %1725 }
 0x5f3   : > { %1749 = vst.msk [vmem:[#allocation2 + $0x50] sm:$0xff] %vm366_vm1, %v1728_v27  ;;  %1748 = vst.msk [vmem:[#allocation2 + $0x48] sm:$0xff] %vm366_vm1, %v1726_v29 }
 0x5f6   : > { %v1732_v30 = vpop.permute.xlu0 %1731  ;;  %v1730_v52 = vpop.permute.xlu1 %1729 }
 0x5f7   : > { %1751 = vst.msk [vmem:[#allocation2 + $0x60] sm:$0xff] %vm366_vm1, %v1732_v30  ;;  %1750 = vst.msk [vmem:[#allocation2 + $0x58] sm:$0xff] %vm366_vm1, %v1730_v52 }
 0x5fa   : > { %v1736_v62 = vpop.permute.xlu0 %1735  ;;  %v1734_v5 = vpop.permute.xlu1 %1733 }
 0x5fb   : > { %1753 = vst.msk [vmem:[#allocation2 + $0x70] sm:$0xff] %vm366_vm1, %v1736_v62  ;;  %1752 = vst.msk [vmem:[#allocation2 + $0x68] sm:$0xff] %vm366_vm1, %v1734_v5 }
 0x5fe   : > { %v1764_v9 = vpop.permute.xlu0 %1763  ;;  %v1738_v13 = vpop.permute.xlu1 %1737 }
 0x5ff   : > { %1787 = vst.msk [vmem:[#allocation2 + $0x80] sm:$0xff] %vm366_vm1, %v1764_v9  ;;  %1754 = vst.msk [vmem:[#allocation2 + $0x78] sm:$0xff] %vm366_vm1, %v1738_v13 }
 0x602   : > { %v1768_v2 = vpop.permute.xlu0 %1767  ;;  %v1766_v32 = vpop.permute.xlu1 %1765 }
 0x603   : > { %1789 = vst.msk [vmem:[#allocation2 + $0x90] sm:$0xff] %vm366_vm1, %v1768_v2  ;;  %1788 = vst.msk [vmem:[#allocation2 + $0x88] sm:$0xff] %vm366_vm1, %v1766_v32 }
 0x606   : > { %v1772_v39 = vpop.permute.xlu0 %1771  ;;  %v1770_v42 = vpop.permute.xlu1 %1769 }
 0x607   : > { %1791 = vst.msk [vmem:[#allocation2 + $0xa0] sm:$0xff] %vm366_vm1, %v1772_v39  ;;  %1790 = vst.msk [vmem:[#allocation2 + $0x98] sm:$0xff] %vm366_vm1, %v1770_v42 }
 0x60a   : > { %v1776_v44 = vpop.permute.xlu0 %1775  ;;  %v1774_v50 = vpop.permute.xlu1 %1773 }
 0x60b   : > { %1793 = vst.msk [vmem:[#allocation2 + $0xb0] sm:$0xff] %vm366_vm1, %v1776_v44  ;;  %1792 = vst.msk [vmem:[#allocation2 + $0xa8] sm:$0xff] %vm366_vm1, %v1774_v50 }
 0x60e   : > { %v1804_v51 = vpop.permute.xlu0 %1803  ;;  %v1778_v53 = vpop.permute.xlu1 %1777 }
 0x60f   : > { %1827 = vst.msk [vmem:[#allocation2 + $0xc0] sm:$0xff] %vm366_vm1, %v1804_v51  ;;  %1794 = vst.msk [vmem:[#allocation2 + $0xb8] sm:$0xff] %vm366_vm1, %v1778_v53 }
 0x612   : > { %v1808_v55 = vpop.permute.xlu0 %1807  ;;  %v1806_v57 = vpop.permute.xlu1 %1805 }
 0x613   : > { %1829 = vst.msk [vmem:[#allocation2 + $0xd0] sm:$0xff] %vm366_vm1, %v1808_v55  ;;  %1828 = vst.msk [vmem:[#allocation2 + $0xc8] sm:$0xff] %vm366_vm1, %v1806_v57 }
 0x616   : > { %v1812_v58 = vpop.permute.xlu0 %1811  ;;  %v1810_v59 = vpop.permute.xlu1 %1809 }
 0x617   : > { %1831 = vst.msk [vmem:[#allocation2 + $0xe0] sm:$0xff] %vm366_vm1, %v1812_v58  ;;  %1830 = vst.msk [vmem:[#allocation2 + $0xd8] sm:$0xff] %vm366_vm1, %v1810_v59 }
 0x61a   : > { %v1816_v61 = vpop.permute.xlu0 %1815  ;;  %v1814_v0 = vpop.permute.xlu1 %1813 }
 0x61b   : > { %1833 = vst.msk [vmem:[#allocation2 + $0xf0] sm:$0xff] %vm366_vm1, %v1816_v61  ;;  %1832 = vst.msk [vmem:[#allocation2 + $0xe8] sm:$0xff] %vm366_vm1, %v1814_v0 }
 0x61e   : > { %v1818_v1 = vpop.permute.xlu1 %1817 }
 0x61f   : > { %1834 = vst.msk [vmem:[#allocation2 + $0xf8] sm:$0xff] %vm366_vm1, %v1818_v1 }
 0x6aa   : > { %v2166_v14 = vpop.f32.mrb[8].mxu0 }
 0x6ab   : > { %v1312_v15 = vadd.f32 %v2166_v14, %v2017_v12  ;;  %v1303_v16 = vpop.f32.mrb[9].mxu0  ;;  %v2032_v14 = vld [vmem:[%s3157_s3 + $0x3] ss:$0 sm:$0xff] }
 0x6ac   : > { %v1304_v19 = vadd.f32 %v2017_v12, %v1303_v16  ;;  %v2167_v20 = vpop.f32.mrb[10].mxu0 }
 0x6ad   : > { %v1344_v22 = vmin.f32 %v1312_v15, 0.0  ;;  %v1315_v54 = vadd.f32 %v2167_v20, %v2017_v12  ;;  %v1306_v25 = vpop.f32.mrb[11].mxu0  ;;  %vm1336_vm3 = vcmp.gt.f32.partialorder %v1312_v15, 0.0 }
 0x6ae   : > { %v1342_v47 = vmin.f32 %v1304_v19, 0.0  ;;  %v1307_v28 = vadd.f32 %v2017_v12, %v1306_v25  ;;  %vm1334_vm5 = vcmp.gt.f32.partialorder %v1304_v19, 0.0 }
 0x6af   : > { %v1354_v56 = vmul.f32 1.442695, %v1344_v22  ;;  %v1345_v8 = vmin.f32 %v1315_v54, 0.0  ;;  %vm1337_vm4 = vcmp.gt.f32.partialorder %v1315_v54, 0.0 }
 0x6b0   : > { %v1350_v34 = vmul.f32 1.442695, %v1342_v47  ;;  %v1343_v6 = vmin.f32 %v1307_v28, 0.0  ;;  %vm1335_vm6 = vcmp.gt.f32.partialorder %v1307_v28, 0.0 }
 0x6b1   : > { %2386 = vpow2.f32 %v1354_v56  ;;  %v1356_v11 = vmul.f32 1.442695, %v1345_v8 }
 0x6b2   : > { %2388 = vpow2.f32 %v1350_v34  ;;  %v1352_v36 = vmul.f32 1.442695, %v1343_v6  ;;  %v2170_v37 = vpop.f32.mrb[12].mxu0 }
 0x6b3   : > { %2390 = vpow2.f32 %v1356_v11  ;;  %v1328_v46 = vadd.f32 %v2170_v37, %v2017_v12  ;;  %v1319_v40 = vpop.f32.mrb[13].mxu0 }
 0x6b4   : > { %2392 = vpow2.f32 %v1352_v36  ;;  %v1320_v60 = vadd.f32 %v2017_v12, %v1319_v40  ;;  %v2171_v45 = vpop.f32.mrb[14].mxu0 }
 0x6b5   : > { %v1348_v48 = vmin.f32 %v1328_v46, 0.0  ;;  %v1331_v38 = vadd.f32 %v2171_v45, %v2017_v12  ;;  %v1322_v24 = vpop.f32.mrb[15].mxu0  ;;  %vm1340_vm8 = vcmp.gt.f32.partialorder %v1328_v46, 0.0 }
 0x6b6   : > { %v1346_v26 = vmin.f32 %v1320_v60, 0.0  ;;  %v1323_v31 = vadd.f32 %v2017_v12, %v1322_v24  ;;  %vm1338_vm10 = vcmp.gt.f32.partialorder %v1320_v60, 0.0  ;;  %v2257_v12 = vld [vmem:[%s3156_s2 + $0x90] sm:$0xff]  }
 0x6b7   : > { %v1362_v33 = vmul.f32 1.442695, %v1348_v48  ;;  %v1349_v35 = vmin.f32 %v1331_v38, 0.0  ;;  %vm1341_vm9 = vcmp.gt.f32.partialorder %v1331_v38, 0.0  ;;  %2194 = vmatprep.subr.bf16.mxu0 %v2257_v12 }
 0x6b8   : > { %v1358_v41 = vmul.f32 1.442695, %v1346_v26  ;;  %v1347_v43 = vmin.f32 %v1323_v31, 0.0  ;;  %vm1339_vm11 = vcmp.gt.f32.partialorder %v1323_v31, 0.0  ;;  %2195 = vmatpush3.bf16.msra.mxu0 %v2257_v12 }
 0x6b9   : > { %2394 = vpow2.f32 %v1362_v33  ;;  %v1364_v49 = vmul.f32 1.442695, %v1349_v35 }
 0x6ba   : > { %2396 = vpow2.f32 %v1358_v41  ;;  %v1360_v17 = vmul.f32 1.442695, %v1347_v43 }
 0x6bb   : > { %v2387_v18 = vpop.eup %2386  ;;  %2398 = vpow2.f32 %v1364_v49 }
 0x6bc   : > { %v2389_v21 = vpop.eup %2388  ;;  %v2026_v23 = vadd.f32 -1.0, %v2387_v18  ;;  %2400 = vpow2.f32 %v1360_v17 }
 0x6bd   : > { %v2391_v63 = vpop.eup %2390  ;;  %v2024_v27 = vadd.f32 -1.0, %v2389_v21 }
 0x6be   : > { %v2393_v29 = vpop.eup %2392  ;;  %v2027_v30 = vadd.f32 -1.0, %v2391_v63  ;;  %v1376_v62 = vsel %vm1336_vm3, %v1312_v15, %v2026_v23 }
 0x6bf   : > { %v2025_v52 = vadd.f32 -1.0, %v2393_v29  ;;  %v1374_v9 = vsel %vm1334_vm5, %v1304_v19, %v2024_v27 }
 0x6c0   : > { %v1377_v5 = vsel %vm1337_vm4, %v1315_v54, %v2027_v30 }
 0x6c1   : > { %v1383_v13 = vpack.c.bf16 %v1377_v5, %v1376_v62  ;;  %v1375_v2 = vsel %vm1335_vm6, %v1307_v28, %v2025_v52 }
 0x6c2   : > { %v1382_v32 = vpack.c.bf16 %v1375_v2, %v1374_v9 }
 0x6c3   : > { %v2395_v39 = vpop.eup %2394 }
 0x6c4   : > { %v2397_v42 = vpop.eup %2396  ;;  %v2030_v44 = vadd.f32 -1.0, %v2395_v39  ;;  %2180 = vmatprep.mubr.msk.bf16.mxu1 %vm1423_vm7, %v1382_v32 }
 0x6c5   : > { %v2399_v50 = vpop.eup %2398  ;;  %v2028_v51 = vadd.f32 -1.0, %v2397_v42  ;;  %2181 = vmatmul.mubr.msk.bf16.vlgmr.msra.gmra.mrb[8].mxu1 %vm1423_vm7, %v1383_v13 }
 0x6c6   : > { %v2401_v53 = vpop.eup %2400  ;;  %v2031_v55 = vadd.f32 -1.0, %v2399_v50  ;;  %v1380_v58 = vsel %vm1340_vm8, %v1328_v46, %v2030_v44  ;;  %2208 = vmatpush3.bf16.msra.mxu1 %v2254_v4 }
 0x6c7   : > { %v2029_v57 = vadd.f32 -1.0, %v2401_v53  ;;  %v1378_v61 = vsel %vm1338_vm10, %v1320_v60, %v2028_v51  ;;  %2205 = vmatprep.subr.bf16.mxu1 %v2255_v7 }
 0x6c8   : > { %v1381_v59 = vsel %vm1341_vm9, %v1331_v38, %v2031_v55 }
 0x6c9   : > { %v1385_v0 = vpack.c.bf16 %v1381_v59, %v1380_v58  ;;  %v1379_v1 = vsel %vm1339_vm11, %v1323_v31, %v2029_v57 }
 0x6ca   : > { %v1384_v3 = vpack.c.bf16 %v1379_v1, %v1378_v61  ;;  %2209 = vmatpush3.bf16.msra.mxu1 %v2255_v7  ;;  %v2049_v7 = vld [vmem:[%s3157_s3 + $0x4] ss:$0 sm:$0xff] }
 0x6cb   : > { %2206 = vmatprep.subr.bf16.mxu1 %v2256_v10 }
 0x6cc   : > { %2184 = vmatprep.mubr.msk.bf16.mxu1 %vm1423_vm7, %v1384_v3 }
 0x6cd   : > { %2185 = vmatmul.mubr.msk.bf16.gmra.mrb[12].mxu1 %vm1423_vm7, %v1385_v0 }
 0x6ce   : > { %2210 = vmatpush3.bf16.msra.mxu1 %v2256_v10 }
 0x6cf   : > { %2207 = vmatprep.subr.bf16.mxu1 %v2257_v12 }
 0x6d2   : > { %2211 = vmatpush3.bf16.msra.mxu1 %v2257_v12 }
 0x798   : > { %v2182_v15 = vpop.f32.mrb[8].mxu1 }
 0x799   : > { %v1479_v16 = vadd.f32 %v2182_v15, %v2032_v14  ;;  %v1470_v19 = vpop.f32.mrb[9].mxu1 }
 0x79a   : > { %v1471_v20 = vadd.f32 %v2032_v14, %v1470_v19  ;;  %v2183_v22 = vpop.f32.mrb[10].mxu1 }
 0x79b   : > { %v1511_v54 = vmin.f32 %v1479_v16, 0.0  ;;  %v1482_v25 = vadd.f32 %v2183_v22, %v2032_v14  ;;  %v1473_v47 = vpop.f32.mrb[11].mxu1  ;;  %vm1503_vm12 = vcmp.gt.f32.partialorder %v1479_v16, 0.0 }
 0x79c   : > { %v1509_v28 = vmin.f32 %v1471_v20, 0.0  ;;  %v1474_v56 = vadd.f32 %v2032_v14, %v1473_v47  ;;  %vm1501_vm14 = vcmp.gt.f32.partialorder %v1471_v20, 0.0 }
 0x79d   : > { %v1521_v8 = vmul.f32 1.442695, %v1511_v54  ;;  %v1512_v34 = vmin.f32 %v1482_v25, 0.0  ;;  %vm1504_vm13 = vcmp.gt.f32.partialorder %v1482_v25, 0.0 }
 0x79e   : > { %v1517_v6 = vmul.f32 1.442695, %v1509_v28  ;;  %v1510_v11 = vmin.f32 %v1474_v56, 0.0  ;;  %vm1502_vm15 = vcmp.gt.f32.partialorder %v1474_v56, 0.0 }
 0x79f   : > { %2402 = vpow2.f32 %v1521_v8  ;;  %v1523_v36 = vmul.f32 1.442695, %v1512_v34 }
 0x7a0   : > { %2404 = vpow2.f32 %v1517_v6  ;;  %v1519_v37 = vmul.f32 1.442695, %v1510_v11  ;;  %v2186_v46 = vpop.f32.mrb[12].mxu1  ;;  %v1839_v11 = vld [vmem:[#allocation2] sm:$0xff] (!%p2058_p5) }
 0x7a1   : > { %2406 = vpow2.f32 %v1523_v36  ;;  %v1495_v40 = vadd.f32 %v2186_v46, %v2032_v14  ;;  %v1486_v60 = vpop.f32.mrb[13].mxu1  ;;  %v1840_v36 = vld [vmem:[#allocation2 + $0x8] sm:$0xff] (!%p2058_p5)  ;;  %1871 = vst.msk [vmem:[%s3159_s5] sm:$0xff] (!%p2058_p5), %vm366_vm1, %v1839_v11  ;;  %v1842_v46 = vld [vmem:[#allocation2 + $0x18] sm:$0xff] (!%p2058_p5) }
 0x7a2   : > { %2408 = vpow2.f32 %v1519_v37  ;;  %v1487_v45 = vadd.f32 %v2032_v14, %v1486_v60  ;;  %v2187_v48 = vpop.f32.mrb[14].mxu1  ;;  %v1841_v37 = vld [vmem:[#allocation2 + $0x10] sm:$0xff] (!%p2058_p5)  ;;  %1872 = vst.msk [vmem:[%s3159_s5 + $0x8] sm:$0xff] (!%p2058_p5), %vm366_vm1, %v1840_v36  ;;  %v1844_v60 = vld [vmem:[#allocation2 + $0x28] sm:$0xff] (!%p2058_p5)  ;;  %1874 = vst.msk [vmem:[%s3159_s5 + $0x18] sm:$0xff] (!%p2058_p5), %vm366_vm1, %v1842_v46 }
 0x7a3   : > { %v1515_v38 = vmin.f32 %v1495_v40, 0.0  ;;  %v1498_v24 = vadd.f32 %v2187_v48, %v2032_v14  ;;  %v1489_v26 = vpop.f32.mrb[15].mxu1  ;;  %vm1507_vm0 = vcmp.gt.f32.partialorder %v1495_v40, 0.0  ;;  %1873 = vst.msk [vmem:[%s3159_s5 + $0x10] sm:$0xff] (!%p2058_p5), %vm366_vm1, %v1841_v37  ;;  %1876 = vst.msk [vmem:[%s3159_s5 + $0x28] sm:$0xff] (!%p2058_p5), %vm366_vm1, %v1844_v60  ;;  %v1846_v48 = vld [vmem:[#allocation2 + $0x38] sm:$0xff] (!%p2058_p5) }
 0x7a4   : > { %v1513_v31 = vmin.f32 %v1487_v45, 0.0  ;;  %v1490_v33 = vadd.f32 %v2032_v14, %v1489_v26  ;;  %vm1505_vm3 = vcmp.gt.f32.partialorder %v1487_v45, 0.0  ;;  %1878 = vst.msk [vmem:[%s3159_s5 + $0x38] sm:$0xff] (!%p2058_p5), %vm366_vm1, %v1846_v48  ;;  %v1849_v26 = vld [vmem:[#allocation2 + $0x50] sm:$0xff] (!%p2058_p5) }
 0x7a5   : > { %v1529_v35 = vmul.f32 1.442695, %v1515_v38  ;;  %v1516_v41 = vmin.f32 %v1498_v24, 0.0  ;;  %vm1508_vm2 = vcmp.gt.f32.partialorder %v1498_v24, 0.0  ;;  %v1847_v38 = vld [vmem:[#allocation2 + $0x40] sm:$0xff] (!%p2058_p5)  ;;  %1881 = vst.msk [vmem:[%s3159_s5 + $0x50] sm:$0xff] (!%p2058_p5), %vm366_vm1, %v1849_v26 }
 0x7a6   : > { %v1525_v43 = vmul.f32 1.442695, %v1513_v31  ;;  %v1514_v49 = vmin.f32 %v1490_v33, 0.0  ;;  %vm1506_vm4 = vcmp.gt.f32.partialorder %v1490_v33, 0.0  ;;  %1879 = vst.msk [vmem:[%s3159_s5 + $0x40] sm:$0xff] (!%p2058_p5), %vm366_vm1, %v1847_v38  ;;  %v1850_v31 = vld [vmem:[#allocation2 + $0x58] sm:$0xff] (!%p2058_p5) }
 0x7a7   : > { %2410 = vpow2.f32 %v1529_v35  ;;  %v1531_v17 = vmul.f32 1.442695, %v1516_v41  ;;  %1882 = vst.msk [vmem:[%s3159_s5 + $0x58] sm:$0xff] (!%p2058_p5), %vm366_vm1, %v1850_v31  ;;  %v1852_v35 = vld [vmem:[#allocation2 + $0x68] sm:$0xff] (!%p2058_p5)  ;;  %v1853_v41 = vld [vmem:[#allocation2 + $0x70] sm:$0xff] (!%p2058_p5) }
 0x7a8   : > { %2412 = vpow2.f32 %v1525_v43  ;;  %v1527_v18 = vmul.f32 1.442695, %v1514_v49  ;;  %1884 = vst.msk [vmem:[%s3159_s5 + $0x68] sm:$0xff] (!%p2058_p5), %vm366_vm1, %v1852_v35  ;;  %1885 = vst.msk [vmem:[%s3159_s5 + $0x70] sm:$0xff] (!%p2058_p5), %vm366_vm1, %v1853_v41  ;;  %v1854_v43 = vld [vmem:[#allocation2 + $0x78] sm:$0xff] (!%p2058_p5)  ;;  %v1855_v49 = vld [vmem:[#allocation2 + $0x80] sm:$0xff] (!%p2058_p5) }
 0x7a9   : > { %v2403_v21 = vpop.eup %2402  ;;  %2414 = vpow2.f32 %v1531_v17  ;;  %v1856_v17 = vld [vmem:[#allocation2 + $0x88] sm:$0xff] (!%p2058_p5)  ;;  %1886 = vst.msk [vmem:[%s3159_s5 + $0x78] sm:$0xff] (!%p2058_p5), %vm366_vm1, %v1854_v43  ;;  %1887 = vst.msk [vmem:[%s3159_s5 + $0x80] sm:$0xff] (!%p2058_p5), %vm366_vm1, %v1855_v49 }
 0x7aa   : > { %v2405_v23 = vpop.eup %2404  ;;  %v2043_v63 = vadd.f32 -1.0, %v2403_v21  ;;  %2416 = vpow2.f32 %v1527_v18  ;;  %1888 = vst.msk [vmem:[%s3159_s5 + $0x88] sm:$0xff] (!%p2058_p5), %vm366_vm1, %v1856_v17  ;;  %v1857_v18 = vld [vmem:[#allocation2 + $0x90] sm:$0xff] (!%p2058_p5)  ;;  %v1858_v21 = vld [vmem:[#allocation2 + $0x98] sm:$0xff] (!%p2058_p5) }
 0x7ab   : > { %v2407_v27 = vpop.eup %2406  ;;  %v2041_v29 = vadd.f32 -1.0, %v2405_v23  ;;  %v1859_v23 = vld [vmem:[#allocation2 + $0xa0] sm:$0xff] (!%p2058_p5)  ;;  %1889 = vst.msk [vmem:[%s3159_s5 + $0x90] sm:$0xff] (!%p2058_p5), %vm366_vm1, %v1857_v18  ;;  %1890 = vst.msk [vmem:[%s3159_s5 + $0x98] sm:$0xff] (!%p2058_p5), %vm366_vm1, %v1858_v21 }
 0x7ac   : > { %v2409_v30 = vpop.eup %2408  ;;  %v2044_v52 = vadd.f32 -1.0, %v2407_v27  ;;  %v1543_v5 = vsel %vm1503_vm12, %v1479_v16, %v2043_v63  ;;  %1891 = vst.msk [vmem:[%s3159_s5 + $0xa0] sm:$0xff] (!%p2058_p5), %vm366_vm1, %v1859_v23  ;;  %v1860_v63 = vld [vmem:[#allocation2 + $0xa8] sm:$0xff] (!%p2058_p5)  ;;  %v1861_v27 = vld [vmem:[#allocation2 + $0xb0] sm:$0xff] (!%p2058_p5) }
 0x7ad   : > { %v2042_v62 = vadd.f32 -1.0, %v2409_v30  ;;  %v1541_v13 = vsel %vm1501_vm14, %v1471_v20, %v2041_v29  ;;  %v1862_v29 = vld [vmem:[#allocation2 + $0xb8] sm:$0xff] (!%p2058_p5)  ;;  %1892 = vst.msk [vmem:[%s3159_s5 + $0xa8] sm:$0xff] (!%p2058_p5), %vm366_vm1, %v1860_v63  ;;  %1893 = vst.msk [vmem:[%s3159_s5 + $0xb0] sm:$0xff] (!%p2058_p5), %vm366_vm1, %v1861_v27  ;;  %v1863_v30 = vld [vmem:[#allocation2 + $0xc0] sm:$0xff] (!%p2058_p5) }
 0x7ae   : > { %v1544_v9 = vsel %vm1504_vm13, %v1482_v25, %v2044_v52  ;;  %1894 = vst.msk [vmem:[%s3159_s5 + $0xb8] sm:$0xff] (!%p2058_p5), %vm366_vm1, %v1862_v29  ;;  %v1864_v52 = vld [vmem:[#allocation2 + $0xc8] sm:$0xff] (!%p2058_p5)  ;;  %1895 = vst.msk [vmem:[%s3159_s5 + $0xc0] sm:$0xff] (!%p2058_p5), %vm366_vm1, %v1863_v30 }
 0x7af   : > { %v1550_v2 = vpack.c.bf16 %v1544_v9, %v1543_v5  ;;  %v1542_v32 = vsel %vm1502_vm15, %v1474_v56, %v2042_v62  ;;  %v1865_v62 = vld [vmem:[#allocation2 + $0xd0] sm:$0xff] (!%p2058_p5)  ;;  %1896 = vst.msk [vmem:[%s3159_s5 + $0xc8] sm:$0xff] (!%p2058_p5), %vm366_vm1, %v1864_v52  ;;  %v1866_v5 = vld [vmem:[#allocation2 + $0xd8] sm:$0xff] (!%p2058_p5)  ;;  %v1867_v9 = vld [vmem:[#allocation2 + $0xe0] sm:$0xff] (!%p2058_p5) }
 0x7b0   : > { %v1549_v39 = vpack.c.bf16 %v1542_v32, %v1541_v13  ;;  %1897 = vst.msk [vmem:[%s3159_s5 + $0xd0] sm:$0xff] (!%p2058_p5), %vm366_vm1, %v1865_v62  ;;  %v1868_v13 = vld [vmem:[#allocation2 + $0xe8] sm:$0xff] (!%p2058_p5)  ;;  %1898 = vst.msk [vmem:[%s3159_s5 + $0xd8] sm:$0xff] (!%p2058_p5), %vm366_vm1, %v1866_v5  ;;  %v1870_v32 = vld [vmem:[#allocation2 + $0xf8] sm:$0xff] (!%p2058_p5) }
 0x7b1   : > { %v2411_v42 = vpop.eup %2410  ;;  %1899 = vst.msk [vmem:[%s3159_s5 + $0xe0] sm:$0xff] (!%p2058_p5), %vm366_vm1, %v1867_v9  ;;  %1900 = vst.msk [vmem:[%s3159_s5 + $0xe8] sm:$0xff] (!%p2058_p5), %vm366_vm1, %v1868_v13 }
 0x7b2   : > { %v2413_v44 = vpop.eup %2412  ;;  %v2047_v50 = vadd.f32 -1.0, %v2411_v42  ;;  %2196 = vmatprep.mubr.msk.bf16.mxu0 %vm1423_vm7, %v1549_v39  ;;  %1902 = vst.msk [vmem:[%s3159_s5 + $0xf8] sm:$0xff] (!%p2058_p5), %vm366_vm1, %v1870_v32 }
 0x7b3   : > { %v2415_v51 = vpop.eup %2414  ;;  %v2045_v53 = vadd.f32 -1.0, %v2413_v44  ;;  %2197 = vmatmul.mubr.msk.bf16.vlgmr.msra.gmra.mrb[16].mxu0 %vm1423_vm7, %v1550_v2  ;;  %v1869_v2 = vld [vmem:[#allocation2 + $0xf0] sm:$0xff] (!%p2058_p5) }
 0x7b4   : > { %v2417_v55 = vpop.eup %2416  ;;  %v2048_v57 = vadd.f32 -1.0, %v2415_v51  ;;  %v1547_v59 = vsel %vm1507_vm0, %v1495_v40, %v2047_v50  ;;  %v1843_v40 = vld [vmem:[#allocation2 + $0x20] sm:$0xff] (!%p2058_p5)  ;;  %1901 = vst.msk [vmem:[%s3159_s5 + $0xf0] sm:$0xff] (!%p2058_p5), %vm366_vm1, %v1869_v2 }
 0x7b5   : > { %v2046_v58 = vadd.f32 -1.0, %v2417_v55  ;;  %v1545_v0 = vsel %vm1505_vm3, %v1487_v45, %v2045_v53  ;;  %1875 = vst.msk [vmem:[%s3159_s5 + $0x20] sm:$0xff] (!%p2058_p5), %vm366_vm1, %v1843_v40  ;;  %v1845_v45 = vld [vmem:[#allocation2 + $0x30] sm:$0xff] (!%p2058_p5) }
 0x7b6   : > { %v1548_v61 = vsel %vm1508_vm2, %v1498_v24, %v2048_v57  ;;  %1877 = vst.msk [vmem:[%s3159_s5 + $0x30] sm:$0xff] (!%p2058_p5), %vm366_vm1, %v1845_v45  ;;  %v1848_v24 = vld [vmem:[#allocation2 + $0x48] sm:$0xff] (!%p2058_p5) }
 0x7b7   : > { %v1552_v1 = vpack.c.bf16 %v1548_v61, %v1547_v59  ;;  %v1546_v3 = vsel %vm1506_vm4, %v1490_v33, %v2046_v58  ;;  %1880 = vst.msk [vmem:[%s3159_s5 + $0x48] sm:$0xff] (!%p2058_p5), %vm366_vm1, %v1848_v24  ;;  %v1851_v33 = vld [vmem:[#allocation2 + $0x60] sm:$0xff] (!%p2058_p5) }
 0x7b8   : > { %v1551_v4 = vpack.c.bf16 %v1546_v3, %v1545_v0  ;;  %1883 = vst.msk [vmem:[%s3159_s5 + $0x60] sm:$0xff] (!%p2058_p5), %vm366_vm1, %v1851_v33 }
 0x7ba   : > { %2200 = vmatprep.mubr.msk.bf16.mxu1 %vm1423_vm7, %v1551_v4 }
 0x7bb   : > { %2201 = vmatmul.mubr.msk.bf16.vlgmr.msra.gmra.mrb[16].mxu1 %vm1423_vm7, %v1552_v1 }
 0x886   : > { %v2198_v10 = vpop.f32.mrb[16].mxu0 }
 0x887   : > { %v1645_v12 = vadd.f32 %v2198_v10, %v2049_v7  ;;  %v1636_v14 = vpop.f32.mrb[17].mxu0 }
 0x888   : > { %v1637_v15 = vadd.f32 %v2049_v7, %v1636_v14  ;;  %v2199_v16 = vpop.f32.mrb[18].mxu0 }
 0x889   : > { %1669 = vst [vmem:[%s2479_s27 + $0x10] sm:$0xff] %v1645_v12  ;;  %v1648_v19 = vadd.f32 %v2199_v16, %v2049_v7  ;;  %v1639_v20 = vpop.f32.mrb[19].mxu0 }
 0x88a   : > { %1667 = vst [vmem:[%s2479_s27] sm:$0xff] %v1637_v15  ;;  %v1640_v22 = vadd.f32 %v2049_v7, %v1639_v20 }
 0x88b   : > { %1670 = vst [vmem:[%s2479_s27 + $0x18] sm:$0xff] %v1648_v19 }
 0x88c   : > { %1668 = vst [vmem:[%s2479_s27 + $0x8] sm:$0xff] %v1640_v22 }
 0x88e   : > { %v2202_v54 = vpop.f32.mrb[16].mxu1  ;;  %1838 = sbr.rel (%p2058_p5) target bundleno = 2197 (0x895), region = 44 }
 0x88f   : > { %v1661_v25 = vadd.f32 %v2202_v54, %v2049_v7  ;;  %v1652_v47 = vpop.f32.mrb[17].mxu1 }
 0x890   : > { %v1653_v28 = vadd.f32 %v2049_v7, %v1652_v47  ;;  %v2203_v56 = vpop.f32.mrb[18].mxu1 }
 0x891   : > { %1673 = vst [vmem:[%s2479_s27 + $0x30] sm:$0xff] %v1661_v25  ;;  %v1664_v8 = vadd.f32 %v2203_v56, %v2049_v7  ;;  %v1655_v34 = vpop.f32.mrb[19].mxu1 }
 0x892   : > { %1671 = vst [vmem:[%s2479_s27 + $0x20] sm:$0xff] %v1653_v28  ;;  %v1656_v6 = vadd.f32 %v2049_v7, %v1655_v34 }
 0x893   : > { %1674 = vst [vmem:[%s2479_s27 + $0x38] sm:$0xff] %v1664_v8 }
 0x894   : > { %1672 = vst [vmem:[%s2479_s27 + $0x28] sm:$0xff] %v1656_v6 }
 0x895 PF: > { %s16_s18 = sadd.s32 1, %s2424_s18  }
 0x896   : > { %p13_p6 = scmp.ge.s32.totalorder %s16_s18, 10  }
 0x898   :  { %15 = sbr.rel (!%p13_p6) target bundleno = 1 (0x1), region = 85 }

</bundles_post_ra>
